<compile_context>
chip_gen: v5e
topology: v5e:2x2
jax: 0.10.0
libtpu: 0.0.40
codegen_flags: <defaults>
</compile_context>

<pallas_src>
import functools

import jax
import jax.numpy as jnp
from jax import lax
from jax.experimental import pallas as pl
from jax.experimental.pallas import tpu as pltpu


def _cg_block_down_kernel(patch_ref, w1_ref, b1_ref, a1_ref,
                          wdw_ref, mask_ref, b2_ref, a2_ref,
                          wred_ref, fc1w_ref, fc1b_ref, fc2w_ref, fc2b_ref,
                          o_ref, zscr_ref, *, nOut, Ho, Wo, d):
    """One batch element per grid step.

    patch_ref : (1, 9*Cin, S)    im2col patches of the stride-2 3x3 conv, S = Ho*Wo
    w1_ref    : (nOut, 9*Cin)    conv1 weight with BN1 scale folded in
    b1/a1_ref : (nOut, 1)        BN1 bias / PReLU1 alpha
    wdw_ref   : (2*nOut, 9)      depthwise weights (rows 0..nOut-1 loc, rest sur),
                                 BN2 scale folded in, tap index = kh*3+kw
    mask_ref  : (18, S)          border masks (rows 0..8 loc taps, 9..17 sur taps)
    b2/a2_ref : (2*nOut, 1)      BN2 bias / PReLU2 alpha (loc channels then sur)
    wred_ref  : (nOut, 2*nOut)   1x1 reduce conv weight
    fc*_ref   : FGlo MLP weights / biases
    o_ref     : (1, nOut, S)     lane-dense output slab
    zscr_ref  : (nOut, S+2*padf) VMEM scratch, zero-padded flat activation
    """
    S = Ho * Wo
    padf = d * (Wo + 1)            # max |flat tap offset| over both branches

    # ---- Stage 1: dense 3x3 stride-2 conv as one fused-tap matmul (MXU) -----
    y = jnp.dot(w1_ref[...], patch_ref[0],
                preferred_element_type=jnp.float32)            # (nOut, S)
    y = y + b1_ref[...]                                        # folded BN1 bias
    y = jnp.where(y >= 0.0, y, a1_ref[...] * y)                # PReLU1

    # ---- Stage 2: depthwise 3x3 (loc) + dilated depthwise 3x3 (sur), VPU ----
    # Lane-dense: spatial tap (dy, dx) == static lane-shift by dy*Wo + dx of the
    # zero-padded flat slab, multiplied by a precomputed border mask (which
    # zeroes pixels whose flat shift wrapped across an image row / edge).
    zscr_ref[...] = jnp.zeros_like(zscr_ref)
    zscr_ref[:, padf:padf + S] = y

    wdw = wdw_ref[...]                                         # (2*nOut, 9)
    loc = jnp.zeros((nOut, S), jnp.float32)
    sur = jnp.zeros((nOut, S), jnp.float32)
    for kh in range(3):                                        # static unroll
        for kw in range(3):
            t = kh * 3 + kw
            # local branch (dilation 1)
            s = (kh - 1) * Wo + (kw - 1)
            tap = zscr_ref[:, padf + s:padf + s + S]
            loc = loc + wdw[:nOut, t:t + 1] * (tap * mask_ref[t:t + 1, :])
            # surrounding branch (dilation d)
            s = (kh - 1) * d * Wo + (kw - 1) * d
            tap = zscr_ref[:, padf + s:padf + s + S]
            sur = sur + wdw[nOut:, t:t + 1] * (tap * mask_ref[t + 9:t + 10, :])

    joi = jnp.concatenate([loc, sur], axis=0)                  # (2*nOut, S)
    joi = joi + b2_ref[...]                                    # folded BN2 bias
    joi = jnp.where(joi >= 0.0, joi, a2_ref[...] * joi)        # PReLU2

    # ---- Stage 3: 1x1 reduce conv as a single lane-dense matmul (MXU) -------
    red = jnp.dot(wred_ref[...], joi,
                  preferred_element_type=jnp.float32)          # (nOut, S)

    # ---- Stage 4: FGlo — global avg pool + tiny MLP + sigmoid gate ----------
    m = jnp.sum(red, axis=1, keepdims=True) * (1.0 / S)        # (nOut, 1)
    h = jnp.dot(fc1w_ref[...], m,
                preferred_element_type=jnp.float32) + fc1b_ref[...]
    h = jnp.maximum(h, 0.0)
    g = jnp.dot(fc2w_ref[...], h,
                preferred_element_type=jnp.float32) + fc2b_ref[...]
    g = 1.0 / (1.0 + jnp.exp(-g))                              # sigmoid, (nOut, 1)

    o_ref[0] = (red * g).astype(o_ref.dtype)


def context_guided_block_down(x, params, *, dilation=2):
    """Inference forward of ContextGuidedBlock_Down.  x: (N, nIn, H, W) f32."""
    N, nIn, H, W = x.shape
    w1 = params["w1"]                          # (nOut, nIn, 3, 3)
    nOut = w1.shape[0]
    eps = 1e-3
    stride = 2
    Ho = (H + 2 - 3) // stride + 1
    Wo = (W + 2 - 3) // stride + 1
    S = Ho * Wo
    hidden = params["fc1_w"].shape[0]
    padf = dilation * (Wo + 1)
    f32 = jnp.float32

    # ---- wrapper glue: BN folding + im2col (stride handled here, not in-kernel)
    s1 = params["bn1_g"] / jnp.sqrt(params["bn1_v"] + eps)
    b1 = params["bn1_b"] - params["bn1_m"] * s1
    w1_eff = (jnp.transpose(w1, (0, 2, 3, 1)).reshape(nOut, 9 * nIn)
              * s1[:, None]).astype(f32)

    s2 = params["bn2_g"] / jnp.sqrt(params["bn2_v"] + eps)
    b2 = params["bn2_b"] - params["bn2_m"] * s2
    wloc_eff = params["w_loc"].reshape(nOut, 9) * s2[:nOut, None]
    wsur_eff = params["w_sur"].reshape(nOut, 9) * s2[nOut:, None]
    wdw = jnp.concatenate([wloc_eff, wsur_eff], axis=0).astype(f32)  # (2*nOut, 9)
    wred = params["w_red"].reshape(nOut, 2 * nOut).astype(f32)

    x_pad = jnp.pad(x, ((0, 0), (0, 0), (1, 1), (1, 1)))
    taps = []
    for kh in range(3):
        for kw in range(3):
            taps.append(x_pad[:, :, kh:kh + stride * (Ho - 1) + 1:stride,
                                    kw:kw + stride * (Wo - 1) + 1:stride])
    patches = jnp.stack(taps, axis=1).reshape(N, 9 * nIn, S).astype(f32)

    # Border masks for the lane-shift depthwise taps.
    ii = jnp.arange(S, dtype=jnp.int32)
    col, row = ii % Wo, ii // Wo

    def tap_mask(dy, dx):
        return ((col + dx >= 0) & (col + dx < Wo) &
                (row + dy >= 0) & (row + dy < Ho))

    masks = jnp.stack(
        [tap_mask(kh - 1, kw - 1) for kh in range(3) for kw in range(3)]
        + [tap_mask((kh - 1) * dilation, (kw - 1) * dilation)
           for kh in range(3) for kw in range(3)],
        axis=0).astype(f32)                                          # (18, S)

    kernel = functools.partial(_cg_block_down_kernel,
                               nOut=nOut, Ho=Ho, Wo=Wo, d=dilation)

    out_flat = pl.pallas_call(
        kernel,
        out_shape=jax.ShapeDtypeStruct((N, nOut, S), x.dtype),
        grid=(N,),
        in_specs=[
            pl.BlockSpec((1, 9 * nIn, S), lambda n: (n, 0, 0)),       # patches
            pl.BlockSpec((nOut, 9 * nIn), lambda n: (0, 0)),          # w1_eff
            pl.BlockSpec((nOut, 1), lambda n: (0, 0)),                # b1
            pl.BlockSpec((nOut, 1), lambda n: (0, 0)),                # prelu1
            pl.BlockSpec((2 * nOut, 9), lambda n: (0, 0)),            # wdw
            pl.BlockSpec((18, S), lambda n: (0, 0)),                  # tap masks
            pl.BlockSpec((2 * nOut, 1), lambda n: (0, 0)),            # b2
            pl.BlockSpec((2 * nOut, 1), lambda n: (0, 0)),            # prelu2
            pl.BlockSpec((nOut, 2 * nOut), lambda n: (0, 0)),         # wred
            pl.BlockSpec((hidden, nOut), lambda n: (0, 0)),           # fc1_w
            pl.BlockSpec((hidden, 1), lambda n: (0, 0)),              # fc1_b
            pl.BlockSpec((nOut, hidden), lambda n: (0, 0)),           # fc2_w
            pl.BlockSpec((nOut, 1), lambda n: (0, 0)),                # fc2_b
        ],
        out_specs=pl.BlockSpec((1, nOut, S), lambda n: (n, 0, 0)),
        scratch_shapes=[pltpu.VMEM((nOut, S + 2 * padf), f32)],
        compiler_params=pltpu.CompilerParams(
            dimension_semantics=("parallel",)),
    )(patches, w1_eff,
      b1[:, None].astype(f32), params["prelu1"][:, None].astype(f32),
      wdw, masks,
      b2[:, None].astype(f32), params["prelu2"][:, None].astype(f32),
      wred,
      params["fc1_w"].astype(f32), params["fc1_b"][:, None].astype(f32),
      params["fc2_w"].astype(f32), params["fc2_b"][:, None].astype(f32))

    return out_flat.reshape(N, nOut, Ho, Wo)


def _reference(x, params, *, dilation=2):
    """Pure-JAX reference (inference-mode BN), same semantics as the PyTorch module."""
    eps = 1e-3
    nOut = params["w1"].shape[0]
    hp = lax.Precision.HIGHEST

    def bn(t, g, b, m, v):
        s = g / jnp.sqrt(v + eps)
        return t * s[None, :, None, None] + (b - m * s)[None, :, None, None]

    def prelu(t, a):
        return jnp.where(t >= 0, t, a[None, :, None, None] * t)

    dn = ("NCHW", "OIHW", "NCHW")
    y = lax.conv_general_dilated(x, params["w1"], (2, 2), ((1, 1), (1, 1)),
                                 dimension_numbers=dn, precision=hp)
    y = prelu(bn(y, params["bn1_g"], params["bn1_b"], params["bn1_m"], params["bn1_v"]),
              params["prelu1"])
    loc = lax.conv_general_dilated(y, params["w_loc"], (1, 1), ((1, 1), (1, 1)),
                                   dimension_numbers=dn, feature_group_count=nOut,
                                   precision=hp)
    sur = lax.conv_general_dilated(y, params["w_sur"], (1, 1),
                                   ((dilation, dilation), (dilation, dilation)),
                                   rhs_dilation=(dilation, dilation),
                                   dimension_numbers=dn, feature_group_count=nOut,
                                   precision=hp)
    joi = jnp.concatenate([loc, sur], axis=1)
    joi = prelu(bn(joi, params["bn2_g"], params["bn2_b"], params["bn2_m"], params["bn2_v"]),
                params["prelu2"])
    red = lax.conv_general_dilated(joi, params["w_red"], (1, 1), ((0, 0), (0, 0)),
                                   dimension_numbers=dn, precision=hp)
    m = jnp.mean(red, axis=(2, 3))
    h = jnp.maximum(m @ params["fc1_w"].T + params["fc1_b"], 0.0)
    g = jax.nn.sigmoid(h @ params["fc2_w"].T + params["fc2_b"])
    return red * g[:, :, None, None]


if __name__ == "__main__":
    # ContextGuidedBlock_Down(nIn=8, nOut=16, dilation_rate=2, reduction=4)
    N, nIn, H, W = 2, 8, 32, 32
    nOut = 2 * nIn                 # module docstring: nOut = 2 * nIn
    dilation = 2
    reduction = 4                  # so nOut // reduction = 4 (>0)
    hidden = nOut // reduction
    f32 = jnp.float32

    keys = jax.random.split(jax.random.PRNGKey(0), 19)
    x = jax.random.normal(keys[0], (N, nIn, H, W), dtype=f32)

    params = {
        "w1":     jax.random.normal(keys[1], (nOut, nIn, 3, 3), f32) * 0.2,
        "bn1_g":  jax.random.uniform(keys[2], (nOut,), f32, 0.5, 1.5),
        "bn1_b":  jax.random.normal(keys[3], (nOut,), f32) * 0.1,
        "bn1_m":  jax.random.normal(keys[4], (nOut,), f32) * 0.1,
        "bn1_v":  jax.random.uniform(keys[5], (nOut,), f32, 0.5, 1.5),
        "prelu1": jnp.full((nOut,), 0.25, f32)
                  + jax.random.normal(keys[6], (nOut,), f32) * 0.01,
        "w_loc":  jax.random.normal(keys[7], (nOut, 1, 3, 3), f32) * 0.2,
        "w_sur":  jax.random.normal(keys[8], (nOut, 1, 3, 3), f32) * 0.2,
        "bn2_g":  jax.random.uniform(keys[9], (2 * nOut,), f32, 0.5, 1.5),
        "bn2_b":  jax.random.normal(keys[10], (2 * nOut,), f32) * 0.1,
        "bn2_m":  jax.random.normal(keys[11], (2 * nOut,), f32) * 0.1,
        "bn2_v":  jax.random.uniform(keys[12], (2 * nOut,), f32, 0.5, 1.5),
        "prelu2": jnp.full((2 * nOut,), 0.25, f32)
                  + jax.random.normal(keys[13], (2 * nOut,), f32) * 0.01,
        "w_red":  jax.random.normal(keys[14], (nOut, 2 * nOut, 1, 1), f32) * 0.2,
        "fc1_w":  jax.random.normal(keys[15], (hidden, nOut), f32) * 0.2,
        "fc1_b":  jax.random.normal(keys[17], (hidden,), f32) * 0.1,
        "fc2_w":  jax.random.normal(keys[16], (nOut, hidden), f32) * 0.2,
        "fc2_b":  jax.random.normal(keys[18], (nOut,), f32) * 0.1,
    }

    out = jax.block_until_ready(context_guided_block_down(x, params, dilation=dilation))
    ref = _reference(x, params, dilation=dilation)

    assert out.shape == (N, nOut, H // 2, W // 2), (out.shape, ref.shape)
    assert jnp.allclose(out, ref, atol=1e-3, rtol=1e-3), float(jnp.max(jnp.abs(out - ref)))

    print("KERNEL_OK")
</pallas_src>

<mosaic_0001>
module attributes {stable_mosaic.version = 11 : i64} {
  func.func @_cg_block_down_kernel(%arg0: i32, %arg1: memref<1x72x256xf32, #tpu.memory_space<vmem>>, %arg2: memref<16x72xf32, #tpu.memory_space<vmem>>, %arg3: memref<16x1xf32, #tpu.memory_space<vmem>>, %arg4: memref<16x1xf32, #tpu.memory_space<vmem>>, %arg5: memref<32x9xf32, #tpu.memory_space<vmem>>, %arg6: memref<18x256xf32, #tpu.memory_space<vmem>>, %arg7: memref<32x1xf32, #tpu.memory_space<vmem>>, %arg8: memref<32x1xf32, #tpu.memory_space<vmem>>, %arg9: memref<16x32xf32, #tpu.memory_space<vmem>>, %arg10: memref<4x16xf32, #tpu.memory_space<vmem>>, %arg11: memref<4x1xf32, #tpu.memory_space<vmem>>, %arg12: memref<16x4xf32, #tpu.memory_space<vmem>>, %arg13: memref<16x1xf32, #tpu.memory_space<vmem>>, %arg14: memref<1x16x256xf32, #tpu.memory_space<vmem>>, %arg15: memref<16x324xf32, #tpu.memory_space<vmem>>) attributes {dimension_semantics = [#tpu.dimension_semantics<parallel>], iteration_bounds = array<i64: 2>, scalar_prefetch = 0 : i64, scratch_operands = 1 : i64, tpu.core_type = #tpu.core_type<tc>, window_params = [{transform_indices = @transform_0, window_bounds = array<i64: 1, 72, 256>}, {pipeline_mode = #tpu.pipeline_mode<synchronous>, transform_indices = @transform_1, window_bounds = array<i64: 16, 72>}, {pipeline_mode = #tpu.pipeline_mode<synchronous>, transform_indices = @transform_2, window_bounds = array<i64: 16, 1>}, {pipeline_mode = #tpu.pipeline_mode<synchronous>, transform_indices = @transform_3, window_bounds = array<i64: 16, 1>}, {pipeline_mode = #tpu.pipeline_mode<synchronous>, transform_indices = @transform_4, window_bounds = array<i64: 32, 9>}, {pipeline_mode = #tpu.pipeline_mode<synchronous>, transform_indices = @transform_5, window_bounds = array<i64: 18, 256>}, {pipeline_mode = #tpu.pipeline_mode<synchronous>, transform_indices = @transform_6, window_bounds = array<i64: 32, 1>}, {pipeline_mode = #tpu.pipeline_mode<synchronous>, transform_indices = @transform_7, window_bounds = array<i64: 32, 1>}, {pipeline_mode = #tpu.pipeline_mode<synchronous>, transform_indices = @transform_8, window_bounds = array<i64: 16, 32>}, {pipeline_mode = #tpu.pipeline_mode<synchronous>, transform_indices = @transform_9, window_bounds = array<i64: 4, 16>}, {pipeline_mode = #tpu.pipeline_mode<synchronous>, transform_indices = @transform_10, window_bounds = array<i64: 4, 1>}, {pipeline_mode = #tpu.pipeline_mode<synchronous>, transform_indices = @transform_11, window_bounds = array<i64: 16, 4>}, {pipeline_mode = #tpu.pipeline_mode<synchronous>, transform_indices = @transform_12, window_bounds = array<i64: 16, 1>}, {transform_indices = @transform_13, window_bounds = array<i64: 1, 16, 256>}]} {
    %c0 = arith.constant 0 : index
    %c0_0 = arith.constant 0 : index
    %0 = vector.load %arg2[%c0, %c0_0] : memref<16x72xf32, #tpu.memory_space<vmem>>, vector<16x72xf32>
    %c0_1 = arith.constant 0 : index
    %c0_2 = arith.constant 0 : index
    %c0_3 = arith.constant 0 : index
    %1 = vector.load %arg1[%c0_1, %c0_2, %c0_3] : memref<1x72x256xf32, #tpu.memory_space<vmem>>, vector<1x72x256xf32>
    %2 = vector.shape_cast %1 : vector<1x72x256xf32> to vector<72x256xf32>
    %cst = arith.constant dense<0.000000e+00> : vector<16x256xf32>
    %3 = tpu.matmul %0, %2, %cst {dimension_numbers = #tpu.dot_dimension_numbers<[1], [0], [0], [1], [0, 0, 1, 1], [], []>} : vector<16x72xf32>, vector<72x256xf32>, vector<16x256xf32> -> vector<16x256xf32>
    %c0_4 = arith.constant 0 : index
    %c0_5 = arith.constant 0 : index
    %4 = vector.load %arg3[%c0_4, %c0_5] : memref<16x1xf32, #tpu.memory_space<vmem>>, vector<16x1xf32>
    %5 = vector.broadcast %4 : vector<16x1xf32> to vector<16x256xf32>
    %6 = arith.addf %3, %5 : vector<16x256xf32>
    %cst_6 = arith.constant 0.000000e+00 : f32
    %7 = vector.broadcast %cst_6 : f32 to vector<16x256xf32>
    %8 = arith.cmpf oge, %6, %7 : vector<16x256xf32>
    %c0_7 = arith.constant 0 : index
    %c0_8 = arith.constant 0 : index
    %9 = vector.load %arg4[%c0_7, %c0_8] : memref<16x1xf32, #tpu.memory_space<vmem>>, vector<16x1xf32>
    %10 = vector.broadcast %9 : vector<16x1xf32> to vector<16x256xf32>
    %11 = arith.mulf %10, %6 : vector<16x256xf32>
    %12 = arith.select %8, %6, %11 : vector<16x256xi1>, vector<16x256xf32>
    %cst_9 = arith.constant 0.000000e+00 : f32
    %13 = vector.broadcast %cst_9 : f32 to vector<16x324xf32>
    %c0_10 = arith.constant 0 : index
    %c0_11 = arith.constant 0 : index
    %14 = vector.load %arg15[%c0_10, %c0_11] : memref<16x324xf32, #tpu.memory_space<vmem>>, vector<16x324xf32>
    tpu.vector_store %arg15[%c0_10, %c0_11], %13 {strides = array<i32>} : memref<16x324xf32, #tpu.memory_space<vmem>>, vector<16x324xf32>,
    %c0_12 = arith.constant 0 : index
    %c34 = arith.constant 34 : index
    %15 = vector.load %arg15[%c0_12, %c34] : memref<16x324xf32, #tpu.memory_space<vmem>>, vector<16x256xf32>
    tpu.vector_store %arg15[%c0_12, %c34], %12 {strides = array<i32>} : memref<16x324xf32, #tpu.memory_space<vmem>>, vector<16x256xf32>,
    %c0_13 = arith.constant 0 : index
    %c0_14 = arith.constant 0 : index
    %16 = vector.load %arg5[%c0_13, %c0_14] : memref<32x9xf32, #tpu.memory_space<vmem>>, vector<32x9xf32>
    %cst_15 = arith.constant 0.000000e+00 : f32
    %17 = vector.broadcast %cst_15 : f32 to vector<16x256xf32>
    %cst_16 = arith.constant 0.000000e+00 : f32
    %18 = vector.broadcast %cst_16 : f32 to vector<16x256xf32>
    %c0_17 = arith.constant 0 : index
    %c17 = arith.constant 17 : index
    %19 = vector.load %arg15[%c0_17, %c17] : memref<16x324xf32, #tpu.memory_space<vmem>>, vector<16x256xf32>
    %20 = vector.extract_strided_slice %16 {offsets = [0, 0], sizes = [16, 1], strides = [1, 1]} : vector<32x9xf32> to vector<16x1xf32>
    %c0_18 = arith.constant 0 : index
    %c0_19 = arith.constant 0 : index
    %21 = vector.load %arg6[%c0_18, %c0_19] : memref<18x256xf32, #tpu.memory_space<vmem>>, vector<1x256xf32>
    %22 = vector.broadcast %21 : vector<1x256xf32> to vector<16x256xf32>
    %23 = arith.mulf %19, %22 : vector<16x256xf32>
    %24 = vector.broadcast %20 : vector<16x1xf32> to vector<16x256xf32>
    %25 = arith.mulf %24, %23 : vector<16x256xf32>
    %26 = arith.addf %17, %25 : vector<16x256xf32>
    %c0_20 = arith.constant 0 : index
    %c0_21 = arith.constant 0 : index
    %27 = vector.load %arg15[%c0_20, %c0_21] : memref<16x324xf32, #tpu.memory_space<vmem>>, vector<16x256xf32>
    %28 = vector.extract_strided_slice %16 {offsets = [16, 0], sizes = [16, 1], strides = [1, 1]} : vector<32x9xf32> to vector<16x1xf32>
    %c9 = arith.constant 9 : index
    %c0_22 = arith.constant 0 : index
    %29 = vector.load %arg6[%c9, %c0_22] : memref<18x256xf32, #tpu.memory_space<vmem>>, vector<1x256xf32>
    %30 = vector.broadcast %29 : vector<1x256xf32> to vector<16x256xf32>
    %31 = arith.mulf %27, %30 : vector<16x256xf32>
    %32 = vector.broadcast %28 : vector<16x1xf32> to vector<16x256xf32>
    %33 = arith.mulf %32, %31 : vector<16x256xf32>
    %34 = arith.addf %18, %33 : vector<16x256xf32>
    %c0_23 = arith.constant 0 : index
    %c18 = arith.constant 18 : index
    %35 = vector.load %arg15[%c0_23, %c18] : memref<16x324xf32, #tpu.memory_space<vmem>>, vector<16x256xf32>
    %36 = vector.extract_strided_slice %16 {offsets = [0, 1], sizes = [16, 1], strides = [1, 1]} : vector<32x9xf32> to vector<16x1xf32>
    %c1 = arith.constant 1 : index
    %c0_24 = arith.constant 0 : index
    %37 = vector.load %arg6[%c1, %c0_24] : memref<18x256xf32, #tpu.memory_space<vmem>>, vector<1x256xf32>
    %38 = vector.broadcast %37 : vector<1x256xf32> to vector<16x256xf32>
    %39 = arith.mulf %35, %38 : vector<16x256xf32>
    %40 = vector.broadcast %36 : vector<16x1xf32> to vector<16x256xf32>
    %41 = arith.mulf %40, %39 : vector<16x256xf32>
    %42 = arith.addf %26, %41 : vector<16x256xf32>
    %c0_25 = arith.constant 0 : index
    %c2 = arith.constant 2 : index
    %43 = vector.load %arg15[%c0_25, %c2] : memref<16x324xf32, #tpu.memory_space<vmem>>, vector<16x256xf32>
    %44 = vector.extract_strided_slice %16 {offsets = [16, 1], sizes = [16, 1], strides = [1, 1]} : vector<32x9xf32> to vector<16x1xf32>
    %c10 = arith.constant 10 : index
    %c0_26 = arith.constant 0 : index
    %45 = vector.load %arg6[%c10, %c0_26] : memref<18x256xf32, #tpu.memory_space<vmem>>, vector<1x256xf32>
    %46 = vector.broadcast %45 : vector<1x256xf32> to vector<16x256xf32>
    %47 = arith.mulf %43, %46 : vector<16x256xf32>
    %48 = vector.broadcast %44 : vector<16x1xf32> to vector<16x256xf32>
    %49 = arith.mulf %48, %47 : vector<16x256xf32>
    %50 = arith.addf %34, %49 : vector<16x256xf32>
    %c0_27 = arith.constant 0 : index
    %c19 = arith.constant 19 : index
    %51 = vector.load %arg15[%c0_27, %c19] : memref<16x324xf32, #tpu.memory_space<vmem>>, vector<16x256xf32>
    %52 = vector.extract_strided_slice %16 {offsets = [0, 2], sizes = [16, 1], strides = [1, 1]} : vector<32x9xf32> to vector<16x1xf32>
    %c2_28 = arith.constant 2 : index
    %c0_29 = arith.constant 0 : index
    %53 = vector.load %arg6[%c2_28, %c0_29] : memref<18x256xf32, #tpu.memory_space<vmem>>, vector<1x256xf32>
    %54 = vector.broadcast %53 : vector<1x256xf32> to vector<16x256xf32>
    %55 = arith.mulf %51, %54 : vector<16x256xf32>
    %56 = vector.broadcast %52 : vector<16x1xf32> to vector<16x256xf32>
    %57 = arith.mulf %56, %55 : vector<16x256xf32>
    %58 = arith.addf %42, %57 : vector<16x256xf32>
    %c0_30 = arith.constant 0 : index
    %c4 = arith.constant 4 : index
    %59 = vector.load %arg15[%c0_30, %c4] : memref<16x324xf32, #tpu.memory_space<vmem>>, vector<16x256xf32>
    %60 = vector.extract_strided_slice %16 {offsets = [16, 2], sizes = [16, 1], strides = [1, 1]} : vector<32x9xf32> to vector<16x1xf32>
    %c11 = arith.constant 11 : index
    %c0_31 = arith.constant 0 : index
    %61 = vector.load %arg6[%c11, %c0_31] : memref<18x256xf32, #tpu.memory_space<vmem>>, vector<1x256xf32>
    %62 = vector.broadcast %61 : vector<1x256xf32> to vector<16x256xf32>
    %63 = arith.mulf %59, %62 : vector<16x256xf32>
    %64 = vector.broadcast %60 : vector<16x1xf32> to vector<16x256xf32>
    %65 = arith.mulf %64, %63 : vector<16x256xf32>
    %66 = arith.addf %50, %65 : vector<16x256xf32>
    %c0_32 = arith.constant 0 : index
    %c33 = arith.constant 33 : index
    %67 = vector.load %arg15[%c0_32, %c33] : memref<16x324xf32, #tpu.memory_space<vmem>>, vector<16x256xf32>
    %68 = vector.extract_strided_slice %16 {offsets = [0, 3], sizes = [16, 1], strides = [1, 1]} : vector<32x9xf32> to vector<16x1xf32>
    %c3 = arith.constant 3 : index
    %c0_33 = arith.constant 0 : index
    %69 = vector.load %arg6[%c3, %c0_33] : memref<18x256xf32, #tpu.memory_space<vmem>>, vector<1x256xf32>
    %70 = vector.broadcast %69 : vector<1x256xf32> to vector<16x256xf32>
    %71 = arith.mulf %67, %70 : vector<16x256xf32>
    %72 = vector.broadcast %68 : vector<16x1xf32> to vector<16x256xf32>
    %73 = arith.mulf %72, %71 : vector<16x256xf32>
    %74 = arith.addf %58, %73 : vector<16x256xf32>
    %c0_34 = arith.constant 0 : index
    %c32 = arith.constant 32 : index
    %75 = vector.load %arg15[%c0_34, %c32] : memref<16x324xf32, #tpu.memory_space<vmem>>, vector<16x256xf32>
    %76 = vector.extract_strided_slice %16 {offsets = [16, 3], sizes = [16, 1], strides = [1, 1]} : vector<32x9xf32> to vector<16x1xf32>
    %c12 = arith.constant 12 : index
    %c0_35 = arith.constant 0 : index
    %77 = vector.load %arg6[%c12, %c0_35] : memref<18x256xf32, #tpu.memory_space<vmem>>, vector<1x256xf32>
    %78 = vector.broadcast %77 : vector<1x256xf32> to vector<16x256xf32>
    %79 = arith.mulf %75, %78 : vector<16x256xf32>
    %80 = vector.broadcast %76 : vector<16x1xf32> to vector<16x256xf32>
    %81 = arith.mulf %80, %79 : vector<16x256xf32>
    %82 = arith.addf %66, %81 : vector<16x256xf32>
    %c0_36 = arith.constant 0 : index
    %c34_37 = arith.constant 34 : index
    %83 = vector.load %arg15[%c0_36, %c34_37] : memref<16x324xf32, #tpu.memory_space<vmem>>, vector<16x256xf32>
    %84 = vector.extract_strided_slice %16 {offsets = [0, 4], sizes = [16, 1], strides = [1, 1]} : vector<32x9xf32> to vector<16x1xf32>
    %c4_38 = arith.constant 4 : index
    %c0_39 = arith.constant 0 : index
    %85 = vector.load %arg6[%c4_38, %c0_39] : memref<18x256xf32, #tpu.memory_space<vmem>>, vector<1x256xf32>
    %86 = vector.broadcast %85 : vector<1x256xf32> to vector<16x256xf32>
    %87 = arith.mulf %83, %86 : vector<16x256xf32>
    %88 = vector.broadcast %84 : vector<16x1xf32> to vector<16x256xf32>
    %89 = arith.mulf %88, %87 : vector<16x256xf32>
    %90 = arith.addf %74, %89 : vector<16x256xf32>
    %c0_40 = arith.constant 0 : index
    %c34_41 = arith.constant 34 : index
    %91 = vector.load %arg15[%c0_40, %c34_41] : memref<16x324xf32, #tpu.memory_space<vmem>>, vector<16x256xf32>
    %92 = vector.extract_strided_slice %16 {offsets = [16, 4], sizes = [16, 1], strides = [1, 1]} : vector<32x9xf32> to vector<16x1xf32>
    %c13 = arith.constant 13 : index
    %c0_42 = arith.constant 0 : index
    %93 = vector.load %arg6[%c13, %c0_42] : memref<18x256xf32, #tpu.memory_space<vmem>>, vector<1x256xf32>
    %94 = vector.broadcast %93 : vector<1x256xf32> to vector<16x256xf32>
    %95 = arith.mulf %91, %94 : vector<16x256xf32>
    %96 = vector.broadcast %92 : vector<16x1xf32> to vector<16x256xf32>
    %97 = arith.mulf %96, %95 : vector<16x256xf32>
    %98 = arith.addf %82, %97 : vector<16x256xf32>
    %c0_43 = arith.constant 0 : index
    %c35 = arith.constant 35 : index
    %99 = vector.load %arg15[%c0_43, %c35] : memref<16x324xf32, #tpu.memory_space<vmem>>, vector<16x256xf32>
    %100 = vector.extract_strided_slice %16 {offsets = [0, 5], sizes = [16, 1], strides = [1, 1]} : vector<32x9xf32> to vector<16x1xf32>
    %c5 = arith.constant 5 : index
    %c0_44 = arith.constant 0 : index
    %101 = vector.load %arg6[%c5, %c0_44] : memref<18x256xf32, #tpu.memory_space<vmem>>, vector<1x256xf32>
    %102 = vector.broadcast %101 : vector<1x256xf32> to vector<16x256xf32>
    %103 = arith.mulf %99, %102 : vector<16x256xf32>
    %104 = vector.broadcast %100 : vector<16x1xf32> to vector<16x256xf32>
    %105 = arith.mulf %104, %103 : vector<16x256xf32>
    %106 = arith.addf %90, %105 : vector<16x256xf32>
    %c0_45 = arith.constant 0 : index
    %c36 = arith.constant 36 : index
    %107 = vector.load %arg15[%c0_45, %c36] : memref<16x324xf32, #tpu.memory_space<vmem>>, vector<16x256xf32>
    %108 = vector.extract_strided_slice %16 {offsets = [16, 5], sizes = [16, 1], strides = [1, 1]} : vector<32x9xf32> to vector<16x1xf32>
    %c14 = arith.constant 14 : index
    %c0_46 = arith.constant 0 : index
    %109 = vector.load %arg6[%c14, %c0_46] : memref<18x256xf32, #tpu.memory_space<vmem>>, vector<1x256xf32>
    %110 = vector.broadcast %109 : vector<1x256xf32> to vector<16x256xf32>
    %111 = arith.mulf %107, %110 : vector<16x256xf32>
    %112 = vector.broadcast %108 : vector<16x1xf32> to vector<16x256xf32>
    %113 = arith.mulf %112, %111 : vector<16x256xf32>
    %114 = arith.addf %98, %113 : vector<16x256xf32>
    %c0_47 = arith.constant 0 : index
    %c49 = arith.constant 49 : index
    %115 = vector.load %arg15[%c0_47, %c49] : memref<16x324xf32, #tpu.memory_space<vmem>>, vector<16x256xf32>
    %116 = vector.extract_strided_slice %16 {offsets = [0, 6], sizes = [16, 1], strides = [1, 1]} : vector<32x9xf32> to vector<16x1xf32>
    %c6 = arith.constant 6 : index
    %c0_48 = arith.constant 0 : index
    %117 = vector.load %arg6[%c6, %c0_48] : memref<18x256xf32, #tpu.memory_space<vmem>>, vector<1x256xf32>
    %118 = vector.broadcast %117 : vector<1x256xf32> to vector<16x256xf32>
    %119 = arith.mulf %115, %118 : vector<16x256xf32>
    %120 = vector.broadcast %116 : vector<16x1xf32> to vector<16x256xf32>
    %121 = arith.mulf %120, %119 : vector<16x256xf32>
    %122 = arith.addf %106, %121 : vector<16x256xf32>
    %c0_49 = arith.constant 0 : index
    %c64 = arith.constant 64 : index
    %123 = vector.load %arg15[%c0_49, %c64] : memref<16x324xf32, #tpu.memory_space<vmem>>, vector<16x256xf32>
    %124 = vector.extract_strided_slice %16 {offsets = [16, 6], sizes = [16, 1], strides = [1, 1]} : vector<32x9xf32> to vector<16x1xf32>
    %c15 = arith.constant 15 : index
    %c0_50 = arith.constant 0 : index
    %125 = vector.load %arg6[%c15, %c0_50] : memref<18x256xf32, #tpu.memory_space<vmem>>, vector<1x256xf32>
    %126 = vector.broadcast %125 : vector<1x256xf32> to vector<16x256xf32>
    %127 = arith.mulf %123, %126 : vector<16x256xf32>
    %128 = vector.broadcast %124 : vector<16x1xf32> to vector<16x256xf32>
    %129 = arith.mulf %128, %127 : vector<16x256xf32>
    %130 = arith.addf %114, %129 : vector<16x256xf32>
    %c0_51 = arith.constant 0 : index
    %c50 = arith.constant 50 : index
    %131 = vector.load %arg15[%c0_51, %c50] : memref<16x324xf32, #tpu.memory_space<vmem>>, vector<16x256xf32>
    %132 = vector.extract_strided_slice %16 {offsets = [0, 7], sizes = [16, 1], strides = [1, 1]} : vector<32x9xf32> to vector<16x1xf32>
    %c7 = arith.constant 7 : index
    %c0_52 = arith.constant 0 : index
    %133 = vector.load %arg6[%c7, %c0_52] : memref<18x256xf32, #tpu.memory_space<vmem>>, vector<1x256xf32>
    %134 = vector.broadcast %133 : vector<1x256xf32> to vector<16x256xf32>
    %135 = arith.mulf %131, %134 : vector<16x256xf32>
    %136 = vector.broadcast %132 : vector<16x1xf32> to vector<16x256xf32>
    %137 = arith.mulf %136, %135 : vector<16x256xf32>
    %138 = arith.addf %122, %137 : vector<16x256xf32>
    %c0_53 = arith.constant 0 : index
    %c66 = arith.constant 66 : index
    %139 = vector.load %arg15[%c0_53, %c66] : memref<16x324xf32, #tpu.memory_space<vmem>>, vector<16x256xf32>
    %140 = vector.extract_strided_slice %16 {offsets = [16, 7], sizes = [16, 1], strides = [1, 1]} : vector<32x9xf32> to vector<16x1xf32>
    %c16 = arith.constant 16 : index
    %c0_54 = arith.constant 0 : index
    %141 = vector.load %arg6[%c16, %c0_54] : memref<18x256xf32, #tpu.memory_space<vmem>>, vector<1x256xf32>
    %142 = vector.broadcast %141 : vector<1x256xf32> to vector<16x256xf32>
    %143 = arith.mulf %139, %142 : vector<16x256xf32>
    %144 = vector.broadcast %140 : vector<16x1xf32> to vector<16x256xf32>
    %145 = arith.mulf %144, %143 : vector<16x256xf32>
    %146 = arith.addf %130, %145 : vector<16x256xf32>
    %c0_55 = arith.constant 0 : index
    %c51 = arith.constant 51 : index
    %147 = vector.load %arg15[%c0_55, %c51] : memref<16x324xf32, #tpu.memory_space<vmem>>, vector<16x256xf32>
    %148 = vector.extract_strided_slice %16 {offsets = [0, 8], sizes = [16, 1], strides = [1, 1]} : vector<32x9xf32> to vector<16x1xf32>
    %c8 = arith.constant 8 : index
    %c0_56 = arith.constant 0 : index
    %149 = vector.load %arg6[%c8, %c0_56] : memref<18x256xf32, #tpu.memory_space<vmem>>, vector<1x256xf32>
    %150 = vector.broadcast %149 : vector<1x256xf32> to vector<16x256xf32>
    %151 = arith.mulf %147, %150 : vector<16x256xf32>
    %152 = vector.broadcast %148 : vector<16x1xf32> to vector<16x256xf32>
    %153 = arith.mulf %152, %151 : vector<16x256xf32>
    %154 = arith.addf %138, %153 : vector<16x256xf32>
    %c0_57 = arith.constant 0 : index
    %c68 = arith.constant 68 : index
    %155 = vector.load %arg15[%c0_57, %c68] : memref<16x324xf32, #tpu.memory_space<vmem>>, vector<16x256xf32>
    %156 = vector.extract_strided_slice %16 {offsets = [16, 8], sizes = [16, 1], strides = [1, 1]} : vector<32x9xf32> to vector<16x1xf32>
    %c17_58 = arith.constant 17 : index
    %c0_59 = arith.constant 0 : index
    %157 = vector.load %arg6[%c17_58, %c0_59] : memref<18x256xf32, #tpu.memory_space<vmem>>, vector<1x256xf32>
    %158 = vector.broadcast %157 : vector<1x256xf32> to vector<16x256xf32>
    %159 = arith.mulf %155, %158 : vector<16x256xf32>
    %160 = vector.broadcast %156 : vector<16x1xf32> to vector<16x256xf32>
    %161 = arith.mulf %160, %159 : vector<16x256xf32>
    %162 = arith.addf %146, %161 : vector<16x256xf32>
    %163 = tpu.concatenate %154, %162 in 0 : vector<16x256xf32>, vector<16x256xf32> -> vector<32x256xf32>
    %c0_60 = arith.constant 0 : index
    %c0_61 = arith.constant 0 : index
    %164 = vector.load %arg7[%c0_60, %c0_61] : memref<32x1xf32, #tpu.memory_space<vmem>>, vector<32x1xf32>
    %165 = vector.broadcast %164 : vector<32x1xf32> to vector<32x256xf32>
    %166 = arith.addf %163, %165 : vector<32x256xf32>
    %cst_62 = arith.constant 0.000000e+00 : f32
    %167 = vector.broadcast %cst_62 : f32 to vector<32x256xf32>
    %168 = arith.cmpf oge, %166, %167 : vector<32x256xf32>
    %c0_63 = arith.constant 0 : index
    %c0_64 = arith.constant 0 : index
    %169 = vector.load %arg8[%c0_63, %c0_64] : memref<32x1xf32, #tpu.memory_space<vmem>>, vector<32x1xf32>
    %170 = vector.broadcast %169 : vector<32x1xf32> to vector<32x256xf32>
    %171 = arith.mulf %170, %166 : vector<32x256xf32>
    %172 = arith.select %168, %166, %171 : vector<32x256xi1>, vector<32x256xf32>
    %c0_65 = arith.constant 0 : index
    %c0_66 = arith.constant 0 : index
    %173 = vector.load %arg9[%c0_65, %c0_66] : memref<16x32xf32, #tpu.memory_space<vmem>>, vector<16x32xf32>
    %cst_67 = arith.constant dense<0.000000e+00> : vector<16x256xf32>
    %174 = tpu.matmul %173, %172, %cst_67 {dimension_numbers = #tpu.dot_dimension_numbers<[1], [0], [0], [1], [0, 0, 1, 1], [], []>} : vector<16x32xf32>, vector<32x256xf32>, vector<16x256xf32> -> vector<16x256xf32>
    %cst_68 = arith.constant dense<0.000000e+00> : vector<16xf32>
    %175 = vector.multi_reduction <add>, %174, %cst_68 [1] : vector<16x256xf32> to vector<16xf32>
    %176 = vector.shape_cast %175 : vector<16xf32> to vector<16x1xf32>
    %cst_69 = arith.constant 3.906250e-03 : f32
    %177 = vector.broadcast %cst_69 : f32 to vector<16x1xf32>
    %178 = arith.mulf %176, %177 : vector<16x1xf32>
    %c0_70 = arith.constant 0 : index
    %c0_71 = arith.constant 0 : index
    %179 = vector.load %arg10[%c0_70, %c0_71] : memref<4x16xf32, #tpu.memory_space<vmem>>, vector<4x16xf32>
    %cst_72 = arith.constant dense<0.000000e+00> : vector<4x1xf32>
    %180 = tpu.matmul %179, %178, %cst_72 {dimension_numbers = #tpu.dot_dimension_numbers<[1], [0], [0], [1], [0, 0, 1, 1], [], []>} : vector<4x16xf32>, vector<16x1xf32>, vector<4x1xf32> -> vector<4x1xf32>
    %c0_73 = arith.constant 0 : index
    %c0_74 = arith.constant 0 : index
    %181 = vector.load %arg11[%c0_73, %c0_74] : memref<4x1xf32, #tpu.memory_space<vmem>>, vector<4x1xf32>
    %182 = arith.addf %180, %181 : vector<4x1xf32>
    %cst_75 = arith.constant 0.000000e+00 : f32
    %183 = vector.broadcast %cst_75 : f32 to vector<4x1xf32>
    %184 = arith.maximumf %182, %183 : vector<4x1xf32>
    %c0_76 = arith.constant 0 : index
    %c0_77 = arith.constant 0 : index
    %185 = vector.load %arg12[%c0_76, %c0_77] : memref<16x4xf32, #tpu.memory_space<vmem>>, vector<16x4xf32>
    %cst_78 = arith.constant dense<0.000000e+00> : vector<16x1xf32>
    %186 = tpu.matmul %185, %184, %cst_78 {dimension_numbers = #tpu.dot_dimension_numbers<[1], [0], [0], [1], [0, 0, 1, 1], [], []>} : vector<16x4xf32>, vector<4x1xf32>, vector<16x1xf32> -> vector<16x1xf32>
    %c0_79 = arith.constant 0 : index
    %c0_80 = arith.constant 0 : index
    %187 = vector.load %arg13[%c0_79, %c0_80] : memref<16x1xf32, #tpu.memory_space<vmem>>, vector<16x1xf32>
    %188 = arith.addf %186, %187 : vector<16x1xf32>
    %cst_81 = arith.constant 0.000000e+00 : f32
    %189 = vector.broadcast %cst_81 : f32 to vector<16x1xf32>
    %190 = arith.subf %189, %188 : vector<16x1xf32>
    %191 = math.exp %190 : vector<16x1xf32>
    %cst_82 = arith.constant 1.000000e+00 : f32
    %192 = vector.broadcast %cst_82 : f32 to vector<16x1xf32>
    %193 = arith.addf %192, %191 : vector<16x1xf32>
    %cst_83 = arith.constant 1.000000e+00 : f32
    %194 = vector.broadcast %cst_83 : f32 to vector<16x1xf32>
    %195 = arith.divf %194, %193 : vector<16x1xf32>
    %196 = vector.broadcast %195 : vector<16x1xf32> to vector<16x256xf32>
    %197 = arith.mulf %174, %196 : vector<16x256xf32>
    %c0_84 = arith.constant 0 : index
    %c0_85 = arith.constant 0 : index
    %c0_86 = arith.constant 0 : index
    %198 = vector.load %arg14[%c0_84, %c0_85, %c0_86] : memref<1x16x256xf32, #tpu.memory_space<vmem>>, vector<1x16x256xf32>
    %199 = vector.shape_cast %198 : vector<1x16x256xf32> to vector<16x256xf32>
    %200 = vector.shape_cast %197 : vector<16x256xf32> to vector<1x16x256xf32>
    tpu.vector_store %arg14[%c0_84, %c0_85, %c0_86], %200 {strides = array<i32>} : memref<1x16x256xf32, #tpu.memory_space<vmem>>, vector<1x16x256xf32>,
    return
  }
  func.func @transform_0(%arg0: i32) -> (i32, i32, i32) {
    %c0_i32 = arith.constant 0 : i32
    %c0_i32_0 = arith.constant 0 : i32
    %c0_i32_1 = arith.constant 0 : i32
    return %arg0, %c0_i32, %c0_i32_0 : i32, i32, i32
  }
  func.func @transform_1(%arg0: i32) -> (i32, i32) {
    %c0_i32 = arith.constant 0 : i32
    %c0_i32_0 = arith.constant 0 : i32
    %c0_i32_1 = arith.constant 0 : i32
    return %c0_i32, %c0_i32_0 : i32, i32
  }
  func.func @transform_2(%arg0: i32) -> (i32, i32) {
    %c0_i32 = arith.constant 0 : i32
    %c0_i32_0 = arith.constant 0 : i32
    %c0_i32_1 = arith.constant 0 : i32
    return %c0_i32, %c0_i32_0 : i32, i32
  }
  func.func @transform_3(%arg0: i32) -> (i32, i32) {
    %c0_i32 = arith.constant 0 : i32
    %c0_i32_0 = arith.constant 0 : i32
    %c0_i32_1 = arith.constant 0 : i32
    return %c0_i32, %c0_i32_0 : i32, i32
  }
  func.func @transform_4(%arg0: i32) -> (i32, i32) {
    %c0_i32 = arith.constant 0 : i32
    %c0_i32_0 = arith.constant 0 : i32
    %c0_i32_1 = arith.constant 0 : i32
    return %c0_i32, %c0_i32_0 : i32, i32
  }
  func.func @transform_5(%arg0: i32) -> (i32, i32) {
    %c0_i32 = arith.constant 0 : i32
    %c0_i32_0 = arith.constant 0 : i32
    %c0_i32_1 = arith.constant 0 : i32
    return %c0_i32, %c0_i32_0 : i32, i32
  }
  func.func @transform_6(%arg0: i32) -> (i32, i32) {
    %c0_i32 = arith.constant 0 : i32
    %c0_i32_0 = arith.constant 0 : i32
    %c0_i32_1 = arith.constant 0 : i32
    return %c0_i32, %c0_i32_0 : i32, i32
  }
  func.func @transform_7(%arg0: i32) -> (i32, i32) {
    %c0_i32 = arith.constant 0 : i32
    %c0_i32_0 = arith.constant 0 : i32
    %c0_i32_1 = arith.constant 0 : i32
    return %c0_i32, %c0_i32_0 : i32, i32
  }
  func.func @transform_8(%arg0: i32) -> (i32, i32) {
    %c0_i32 = arith.constant 0 : i32
    %c0_i32_0 = arith.constant 0 : i32
    %c0_i32_1 = arith.constant 0 : i32
    return %c0_i32, %c0_i32_0 : i32, i32
  }
  func.func @transform_9(%arg0: i32) -> (i32, i32) {
    %c0_i32 = arith.constant 0 : i32
    %c0_i32_0 = arith.constant 0 : i32
    %c0_i32_1 = arith.constant 0 : i32
    return %c0_i32, %c0_i32_0 : i32, i32
  }
  func.func @transform_10(%arg0: i32) -> (i32, i32) {
    %c0_i32 = arith.constant 0 : i32
    %c0_i32_0 = arith.constant 0 : i32
    %c0_i32_1 = arith.constant 0 : i32
    return %c0_i32, %c0_i32_0 : i32, i32
  }
  func.func @transform_11(%arg0: i32) -> (i32, i32) {
    %c0_i32 = arith.constant 0 : i32
    %c0_i32_0 = arith.constant 0 : i32
    %c0_i32_1 = arith.constant 0 : i32
    return %c0_i32, %c0_i32_0 : i32, i32
  }
  func.func @transform_12(%arg0: i32) -> (i32, i32) {
    %c0_i32 = arith.constant 0 : i32
    %c0_i32_0 = arith.constant 0 : i32
    %c0_i32_1 = arith.constant 0 : i32
    return %c0_i32, %c0_i32_0 : i32, i32
  }
  func.func @transform_13(%arg0: i32) -> (i32, i32, i32) {
    %c0_i32 = arith.constant 0 : i32
    %c0_i32_0 = arith.constant 0 : i32
    %c0_i32_1 = arith.constant 0 : i32
    return %arg0, %c0_i32, %c0_i32_0 : i32, i32, i32
  }
}

</mosaic_0001>

<bundles_post_ra>
// kernel: tpu_custom_call.1
= control target key start
LH: loop header
LB: loop body
LE: loop exit
PB: predicated region body
PF: predicated region fallthrough
CT: control target
= control target key end

     0   :  { %s3774_s0 = inlined_call_operand.hbm [shape: f32[2,72,256], index: 0, kind: input, shape index: {}]   ;;  %s3775_s1 = inlined_call_operand.vmem [shape: f32[16,72], index: 1, kind: input, shape index: {}]   ;;  %s3776_s2 = inlined_call_operand.vmem [shape: f32[16,1], index: 2, kind: input, shape index: {}]   ;;  %s3777_s3 = inlined_call_operand.vmem [shape: f32[16,1], index: 3, kind: input, shape index: {}]   ;;  %s3778_s4 = inlined_call_operand.vmem [shape: f32[32,9], index: 4, kind: input, shape index: {}]   ;;  %s3779_s5 = inlined_call_operand.vmem [shape: f32[18,256], index: 5, kind: input, shape index: {}]   ;;  %s3780_s6 = inlined_call_operand.vmem [shape: f32[32,1], index: 6, kind: input, shape index: {}]   ;;  %s3781_s7 = inlined_call_operand.vmem [shape: f32[32,1], index: 7, kind: input, shape index: {}]   ;;  %s3782_s8 = inlined_call_operand.vmem [shape: f32[16,32], index: 8, kind: input, shape index: {}]   ;;  %s3783_s9 = inlined_call_operand.vmem [shape: f32[4,16], index: 9, kind: input, shape index: {}]   ;;  %s3784_s10 = inlined_call_operand.vmem [shape: f32[4,1], index: 10, kind: input, shape index: {}]   ;;  %s3785_s11 = inlined_call_operand.vmem [shape: f32[16,4], index: 11, kind: input, shape index: {}]   ;;  %s3786_s12 = inlined_call_operand.vmem [shape: f32[16,1], index: 12, kind: input, shape index: {}]   ;;  %s3787_s13 = inlined_call_operand.hbm [shape: f32[2,16,256], index: 13, kind: output, shape index: {}]  }
   0x1   :  { %3816 = sst [smem:[#allocation28_spill]] %s3774_s0 }
   0x2   :  { %3817 = sst [smem:[#allocation29_spill]] %s3787_s13 }
   0x3   :  { %18 = vsyncpa [#allocation4], 0 }
   0x4   :  { %20 = vsyncpa [#allocation4 + $0x1], 0 }
   0x5   :  { %21 = vsyncpa [#allocation5], 0 }
   0x6   :  { %23 = vsyncpa [#allocation5 + $0x1], 0  ;;  %s2609_s25 = smov 0   ;;  %s2611_s26 = smov 0  }
   0x7   :  { %s2613_s27 = smov 0   ;;  %s2615_s28 = smov 0  }
   0x8 LB: > { %3818 = sst [smem:[#allocation9_spill]] %s2483_s25  ;;  %s2630_s29 = sadd.s32 4294967295, %s2495_s28   ;;  %s2495_s28 = sphi %s2615_s28, %s3863_s28   ;;  %s2491_s27 = sphi %s2613_s27, %s3865_s27   ;;  %s2487_s26 = sphi %s2611_s26, %s3867_s26   ;;  %s2483_s25 = sphi %s2609_s25, %s3866_s25  }
   0x9   : > { %3819 = sst [smem:[#allocation10_spill]] %s2491_s27  ;;  %s2193_s30 = sadd.s32 4294967294, %s2495_s28  }
   0xa   : > { %3820 = sst [smem:[#allocation11_spill]] %s2630_s29  ;;  %s2634_s14 = sadd.s32 1, %s2495_s28  }
   0xb   : > { %3821 = sst [smem:[#allocation12_spill]] %s2634_s14  ;;  %s36_s15 = sadd.s32 1, %s2491_s27 }
   0xc   : > { %s33_s16 = ssub.s32 %s2495_s28, %s2634_s14  ;;  %p43_p0 = scmp.ne.s32.totalorder %s2491_s27, %s2487_s26 }
   0xd   : > { %p34_p1 = scmp.eq.s32.totalorder %s33_s16, 0  ;;  %p44_p2 = scmp.eq.s32.totalorder %s2495_s28, 0 }
   0xe   : > { %p49_p3 = scmp.ne.s32.totalorder %s2487_s26, %s2483_s25  ;;  %p50_p4 = scmp.eq.s32.totalorder %s2630_s29, 0 }
   0xf   : > { %s2646_s17 = scalar_select %p34_p1, %s2491_s27, %s36_s15  }
  0x10   : > { %p45_p5 = por %p44_p2, %p43_p0  ;;  %p2648_p6 = por %p50_p4, %p49_p3 }
  0x11   : > { %3822 = sst [smem:[#allocation13_spill]] %s2646_s17  ;;  %p325_p7 = scmp.eq.s32.totalorder %s2630_s29, 1 }
  0x12   : > { %p331_p8 = scmp.eq.s32.totalorder %s2193_s30, 1  ;;  %p2195_p9 = scmp.ge.s32.totalorder %s2495_s28, 2 }
  0x13   : > { %p2249_p10 = scmp.lt.s32.totalorder %s2495_s28, 2  ;;  %p2655_p11 = por %p325_p7, %p43_p0 }
  0x14   : > { %p2659_p12 = por %p331_p8, %p49_p3  ;;  %s387_s21 = sand.u32 1, %s2491_s27  }
  0x15   : > { %s3824_s19 = scalar_select %p2655_p11, 1, 0 }
  0x16   : > { %s3826_s20 = scalar_select %p2659_p12, 1, 0 }
  0x17   : > { %3825 = sst [smem:[#allocation14_spill]] %s3824_s19  ;;  %s2235_s22 = smul.u32 144, %s2495_s28 }
  0x18   : > { %3827 = sst [smem:[#allocation15_spill]] %s3826_s20  ;;  %s2234_s23 = smul.u32 144, %s387_s21 }
  0x19   : > { %s3828_s0 = sld [smem:[#allocation28_spill]]  ;;  %p2668_p13 = pnand %p2249_p10, %p45_p5 }
  0x1a   : > { %s391_s14 = scalar_lea.vmem [#allocation3], %s2234_s23  ;;  %s388_s19 = scalar_lea.sflag [#allocation4], %s387_s21 }
  0x1b   : > { %s399_s25 = sshll.u32 %s391_s14, 4  ;;  %p2403_p1 = pneg %p2668_p13  ;;  %s400_s25 = int_to_ptr.vmem [resolvable:$true] %s399_s25 }
  0x1f   : > { %s396_s16 = scalar_lea.hbm %s3828_s0, %s2235_s22  ;;  %s2406_s15 = scalar_lea.hbm %s3828_s0, 288 }
  0x20   : > { %s397_s30 = sshll.u32 %s396_s16, 4  ;;  %s398_s30 = int_to_ptr.hbm [resolvable:$true] %s397_s30 }
  0x21   : > { %s2399_s13 = sshra.s32 %s398_s30, 4  ;;  %s2400_s13 = int_to_ptr.hbm [resolvable:$true] %s2399_s13 }
  0x22   : > { %s2401_s27 = scalar_lea.hbm %s2400_s13, 144  ;;  %p2407_p4 = scmp.lt.s32.totalorder %s2400_s13, %s3828_s0 }
  0x23   : > { %p2402_p0 = scmp.ne.s32.totalorder %s2400_s13, %s2401_s27  ;;  %p2408_p5 = scmp.lt.s32.totalorder %s2406_s15, %s2401_s27 }
  0x25   : > { %p2404_p2 = pnand %p2403_p1, %p2402_p0  ;;  %p2409_p7 = por %p2408_p5, %p2407_p4 }
  0x27   : > { %p2405_p3 = pneg %p2404_p2 }
  0x29   : > { %p2410_p8 = pnand %p2409_p7, %p2405_p3 }
  0x2b   : > { %2413 = shalt.err (!%p2410_p8)
}
  0x2c   : > { %s2497_s14 = smov 256   ;;  %s2498_s21 = smov 16  }
  0x2d   : > { %2244 = dma.hbm_to_vmem [thread:$0]  (!%p2668_p13), %s398_s30, 2304, %s400_s25, %s388_s19, %s2497_s14, %s2497_s14, %s2498_s21  }
  0x2e   : > { %p2197_p10 = scmp.ge.s32.totalorder %s2495_s28, 1  ;;  %p407_p0 = scmp.lt.s32.totalorder %s2495_s28, 3 }
  0x30   : > { %p408_p1 = pnand %p2197_p10, %p407_p0 }
  0x32   : > { %411 = sbr.rel (%p408_p1) target bundleno = 1557 (0x615), region = 72 }
  0x37   : > { %s2685_s23 = sand.u32 1, %s2487_s26  }
  0x38   : > { %s2236_s13 = smul.u32 144, %s2685_s23  ;;  %s414_s27 = scalar_lea.sflag [#allocation4], %s2685_s23 }
  0x3a   : > { %s2689_s29 = scalar_lea.vmem [#allocation3], %s2236_s13 }
  0x3b   : > { %2474 = dma.done.wait (%p2648_p6), %s414_s27, 2304  }
  0x3c   : > { %2476 = vsyncadd (%p2648_p6), %s414_s27, 4294964992  ;;  %v3799_v0 = vmov 0   ;;  %v551_v1 = vld [vmem:[%s3777_s3 + $0x8] sm:$0xff]  ;;  %v479_v3 = vld [vmem:[%s2689_s29 + $0x80] sm:$0xff]  ;;  %v2500_v10 = vmov 2   ;;  %s2501_s30 = smov 17  }
  0x3d   : > { %2326 = vset.pattern.permute.xlu1 %v3799_v0  ;;  %2325 = vset.pattern.permute.xlu0 %v3799_v0  ;;  %v482_v2 = vld [vmem:[%s3776_s2 + $0x8] sm:$0xff]  ;;  %v477_v6 = vld [vmem:[%s2689_s29 + $0x70] sm:$0xff]  ;;  %v475_v9 = vld [vmem:[%s2689_s29 + $0x60] sm:$0xff]  ;;  %s2502_s27 = smov 2   ;;  %vm493_vm0 = vcmask 588800   ;;  %s2503_s22 = smov 4  }
  0x3e   : > { %559 = vperm.xlu1 %2326, %v551_v1   ;;  %490 = vperm.xlu0 %2325, %v482_v2   ;;  %v480_v4 = vld [vmem:[%s2689_s29 + $0x88] sm:$0xff]  ;;  %v478_v8 = vld [vmem:[%s2689_s29 + $0x78] sm:$0xff]  ;;  %v473_v12 = vld [vmem:[%s2689_s29 + $0x50] sm:$0xff]  ;;  %v2504_v35 = vmov 1   ;;  %s2505_s21 = smov 32   ;;  %s2506_s18 = smov 34  }
  0x3f   : > { %v615_v5 = vld [vmem:[%s3779_s5] ss:$8 sm:$0x3]  ;;  %507 = vmatpush.msra.mxu0 %v479_v3  ;;  %530 = vmatpush.msra.mxu1 %v480_v4  ;;  %v2205_v13 = vld [vmem:[%s3779_s5 + $0x12] ss:$8 sm:$0x3] }
  0x40   : > { %v617_v7 = vperm.slane %v615_v5, 0  ;;  %2329 = vset.pattern.permute.xlu2 %v2500_v10  ;;  %v476_v11 = vld [vmem:[%s2689_s29 + $0x68] sm:$0xff]  ;;  %v474_v14 = vld [vmem:[%s2689_s29 + $0x58] sm:$0xff]  ;;  %v550_v15 = vld [vmem:[%s3777_s3] sm:$0xff]  ;;  %v761_v19 = vperm.slane %v2205_v13, 0  ;;  %v618_v26 = vperm.slane %v615_v5, 1 }
  0x41   : > { %508 = vmatpush.msra.mxu0 %v477_v6  ;;  %531 = vmatpush.msra.mxu1 %v478_v8  ;;  %v481_v16 = vld [vmem:[%s3776_s2] sm:$0xff]  ;;  %v472_v18 = vld [vmem:[%s2689_s29 + $0x48] sm:$0xff]  ;;  %v470_v21 = vld [vmem:[%s2689_s29 + $0x38] sm:$0xff]  ;;  %v762_v36 = vperm.slane %v2205_v13, 1  ;;  %v2507_v44 = vmov 3   ;;  %v2509_v49 = vmov 4  }
  0x42   : > { %619 = vrot.lane.b32.xlu2 %v617_v7, %s2501_s30  ;;  %v471_v17 = vld [vmem:[%s2689_s29 + $0x40] sm:$0xff]  ;;  %v469_v20 = vld [vmem:[%s2689_s29 + $0x30] sm:$0xff]  ;;  %v468_v23 = vld [vmem:[%s2689_s29 + $0x28] sm:$0xff]  ;;  %s2510_s14 = smov 64   ;;  %v2511_v52 = vmov 5   ;;  %s2512_s17 = smov 68  }
  0x43   : > { %509 = vmatpush.msra.mxu0 %v475_v9  ;;  %532 = vmatpush.msra.mxu1 %v476_v11  ;;  %v467_v22 = vld [vmem:[%s2689_s29 + $0x20] sm:$0xff]  ;;  %v465_v24 = vld [vmem:[%s2689_s29 + $0x10] sm:$0xff]  ;;  %v466_v27 = vld [vmem:[%s2689_s29 + $0x18] sm:$0xff]  ;;  %v3801_v58 = vmov 7   ;;  %s2514_s19 = smov 66   ;;  %v2515_v60 = vmov 6  }
  0x44   : > { %v2207_v25 = vld [vmem:[%s3779_s5 + $0x13] ss:$8 sm:$0x3]  ;;  %v2740_v28 = vld [vmem:[%s3778_s4] sm:$0xff]  ;;  %v462_v37 = vld [vmem:[%s3775_s1 + $0x8] sm:$0xff]  ;;  %s2517_s15 = smov 19  }
  0x45   : > { %510 = vmatpush.msra.mxu0 %v473_v12  ;;  %533 = vmatpush.msra.mxu1 %v474_v14  ;;  %v463_v29 = vld [vmem:[%s2689_s29] sm:$0xff]  ;;  %v464_v30 = vld [vmem:[%s2689_s29 + $0x8] sm:$0xff]  ;;  %v895_v32 = vperm.slane %v2207_v25, 1  ;;  %v894_v33 = vperm.slane %v2207_v25, 0  ;;  %s2508_s29 = smov 36   ;;  %v3797_v4 = vmov 8  }
  0x46   : > { %554 = vperm.xlu1 %2326, %v550_v15   ;;  %485 = vperm.xlu0 %2325, %v481_v16   ;;  %v461_v31 = vld [vmem:[%s3775_s1] sm:$0xff]  ;;  %v2209_v34 = vld [vmem:[%s3779_s5 + $0x14] ss:$8 sm:$0x3]  ;;  %s2519_s25 = smov 33   ;;  %v2839_v9 = vld [vmem:[%s3778_s4 + $0x8] sm:$0xff] }
  0x47   : > { %511 = vmatpush.msra.mxu0 %v471_v17  ;;  %534 = vmatpush.msra.mxu1 %v472_v18  ;;  %v1029_v38 = vperm.slane %v2209_v34, 1  ;;  %v1028_v39 = vperm.slane %v2209_v34, 0  ;;  %v2765_v40 = vld [vmem:[%s3778_s4 + $0x18] sm:$0xff]  ;;  %v2775_v42 = vld [vmem:[%s3778_s4 + $0x10] sm:$0xff]  ;;  %s2521_s13 = smov 50   ;;  %vm572_vm5 = vcmask 556032  }
  0x48   : > { %v2211_v41 = vld [vmem:[%s3779_s5 + $0x15] ss:$8 sm:$0x3]  ;;  %v2213_v46 = vld [vmem:[%s3779_s5 + $0x16] ss:$8 sm:$0x3] }
  0x49   : > { %512 = vmatpush.msra.mxu0 %v469_v20  ;;  %535 = vmatpush.msra.mxu1 %v470_v21  ;;  %v1161_v43 = vperm.slane %v2211_v41, 0  ;;  %v1162_v45 = vperm.slane %v2211_v41, 1  ;;  %v1295_v47 = vperm.slane %v2213_v46, 1  ;;  %v1294_v48 = vperm.slane %v2213_v46, 0  ;;  %s2527_s20 = smov 94   ;;  %s2528_s16 = smov 92  }
  0x4a   : > { %763 = vrot.lane.b32.xlu2 %v761_v19, %s2502_s27  ;;  %v2215_v50 = vld [vmem:[%s3779_s5 + $0x17] ss:$8 sm:$0x3]  ;;  %v2217_v54 = vld [vmem:[%s3779_s5 + $0x20] ss:$8 sm:$0x3] }
  0x4b   : > { %513 = vmatpush.msra.mxu0 %v467_v22  ;;  %536 = vmatpush.msra.mxu1 %v468_v23  ;;  %v1427_v51 = vperm.slane %v2215_v50, 0  ;;  %v1428_v53 = vperm.slane %v2215_v50, 1  ;;  %v2219_v55 = vld [vmem:[%s3779_s5 + $0x21] ss:$8 sm:$0x3]  ;;  %v1561_v57 = vperm.slane %v2217_v54, 1 }
  0x4c   : > { %v1693_v56 = vperm.slane %v2219_v55, 0  ;;  %v1560_v59 = vperm.slane %v2217_v54, 0  ;;  %v2204_v61 = vld [vmem:[%s3779_s5 + $0x1] ss:$8 sm:$0x3]  ;;  %v1694_v63 = vperm.slane %v2219_v55, 1 }
  0x4d   : > { %514 = vmatpush.msra.mxu0 %v465_v24  ;;  %537 = vmatpush.msra.mxu1 %v466_v27  ;;  %v692_v62 = vperm.slane %v2204_v61, 0  ;;  %v2206_v1 = vld [vmem:[%s3779_s5 + $0x2] ss:$8 sm:$0x3]  ;;  %v693_v13 = vperm.slane %v2204_v61, 1  ;;  %vm598_vm6 = vcmask 1047824  }
  0x4e   : > { %636 = vperm.xlu1 %2326, %v2740_v28   ;;  %621 = vrot.lane.b32.xlu0 %v618_v26, %s2501_s30  ;;  %v826_v3 = vperm.slane %v2206_v1, 0  ;;  %v2208_v5 = vld [vmem:[%s3779_s5 + $0x3] ss:$8 sm:$0x3]  ;;  %v827_v17 = vperm.slane %v2206_v1, 1  ;;  %vm589_vm7 = vcmask 277504  }
  0x4f   : > { %515 = vmatpush.msra.mxu0 %v463_v29  ;;  %538 = vmatpush.msra.mxu1 %v464_v30  ;;  %v959_v7 = vperm.slane %v2208_v5, 0  ;;  %v960_v20 = vperm.slane %v2208_v5, 1  ;;  %vm767_vm8 = vcmask 15360   ;;  %vm900_vm9 = vcmask 31744  }
  0x50   : > { %2199 = vmatmul.msk.f32.vlgmr.msra.gmra.mxu0 %vm493_vm0, %v461_v31  ;;  %2201 = vmatmul.msk.f32.vlgmr.msra.gmra.mxu1 %vm493_vm0, %v461_v31  ;;  %vm1034_vm10 = vcmask 261120   ;;  %vm1231_vm11 = vcmask 285696   ;;  %vm1300_vm12 = vcmask 293888   ;;  %vm1433_vm13 = vcmask 523264  }
  0x51   : > { %2327 = vset.pattern.permute.xlu0 %v2504_v35  ;;  %vm1365_vm14 = vcmask 400384   ;;  %vm1566_vm15 = vcmask 539648  }
  0x52   : > { %898 = vrot.lane.b32.xlu2 %v895_v32, %s2503_s22  ;;  %v2212_v32 = vld [vmem:[%s3779_s5 + $0x5] ss:$8 sm:$0x3] }
  0x53   : > { %v1225_v55 = vperm.slane %v2212_v32, 0 }
  0x56   : > { %896 = vrot.lane.b32.xlu1 %v894_v33, %s2503_s22  ;;  %765 = vrot.lane.b32.xlu0 %v762_v36, %s2502_s27  ;;  %s2516_s22 = smov 18   ;;  %v1226_v36 = vperm.slane %v2212_v32, 1  ;;  %s2524_s27 = smov 96  }
  0x57   : > { %2328 = vset.pattern.permute.xlu1 %v2504_v35 }
  0x58   : > { %2200 = vmatmul.msk.f32.gmra.mxu0 %vm493_vm0, %v462_v37  ;;  %2202 = vmatmul.msk.f32.gmra.mxu1 %vm493_vm0, %v462_v37  ;;  %vm698_vm0 = vcmask 146432  }
  0x5a   : > { %1032 = vrot.lane.b32.xlu2 %v1029_v38, %s2505_s21 }
  0x5e   : > { %1030 = vrot.lane.b32.xlu1 %v1028_v39, %s2505_s21  ;;  %783 = vperm.xlu0 %2327, %v2765_v40  }
  0x62   : > { %916 = vperm.xlu2 %2329, %v2765_v40  }
  0x66   : > { %779 = vperm.xlu1 %2328, %v2775_v42   ;;  %1163 = vrot.lane.b32.xlu0 %v1161_v43, %s2506_s18 }
  0x67   : > { %2330 = vset.pattern.permute.xlu0 %v2507_v44 }
  0x6a   : > { %912 = vperm.xlu2 %2329, %v2775_v42  }
  0x6e   : > { %1165 = vrot.lane.b32.xlu1 %v1162_v45, %s2506_s18  ;;  %1050 = vperm.xlu0 %2330, %v2765_v40  }
  0x6f   : > { %2331 = vset.pattern.permute.xlu1 %v2507_v44 }
  0x72   : > { %1298 = vrot.lane.b32.xlu2 %v1295_v47, %s2508_s29 }
  0x73   : > { %2332 = vset.pattern.permute.xlu2 %v2509_v49 }
  0x76   : > { %1296 = vrot.lane.b32.xlu1 %v1294_v48, %s2508_s29  ;;  %1429 = vrot.lane.b32.xlu0 %v1427_v51, %s2510_s14  ;;  %s2520_s29 = smov 35  }
  0x77   : > { %2333 = vset.pattern.permute.xlu0 %v2511_v52 }
  0x7a   : > { %1182 = vperm.xlu2 %2332, %v2765_v40  }
  0x7e   : > { %1046 = vperm.xlu1 %2331, %v2775_v42   ;;  %1316 = vperm.xlu0 %2333, %v2765_v40  }
  0x82   : > { %1178 = vperm.xlu2 %2332, %v2775_v42  }
  0x86   : > { %1431 = vrot.lane.b32.xlu1 %v1428_v53, %s2510_s14  ;;  %1695 = vrot.lane.b32.xlu0 %v1693_v56, %s2512_s17 }
  0x87   : > { %2334 = vset.pattern.permute.xlu1 %v2511_v52  ;;  %2336 = vset.pattern.permute.xlu0 %v3801_v58 }
  0x8a   : > { %1564 = vrot.lane.b32.xlu2 %v1561_v57, %s2514_s19  ;;  %v2216_v57 = vld [vmem:[%s3779_s5 + $0x7] ss:$8 sm:$0x3] }
  0x8b   : > { %2335 = vset.pattern.permute.xlu2 %v2515_v60  ;;  %v1492_v61 = vperm.slane %v2216_v57, 1 }
  0x8e   : > { %1562 = vrot.lane.b32.xlu1 %v1560_v59, %s2514_s19  ;;  %1582 = vperm.xlu0 %2336, %v2765_v40   ;;  %s2526_s19 = smov 124  }
  0x92   : > { %1449 = vperm.xlu2 %2335, %v2765_v40  }
  0x96   : > { %1312 = vperm.xlu1 %2334, %v2775_v42   ;;  %694 = vrot.lane.b32.xlu0 %v692_v62, %s2516_s22 }
  0x97   : > { %2342 = vset.pattern.permute.xlu0 %v2500_v10 }
  0x9a   : > { %1445 = vperm.xlu2 %2335, %v2775_v42  }
  0x9c   : > { %v2819_v2 = vpop.permute.xlu2 %619 }
  0x9d   : > { %3830 = vst [vmem:[#allocation16_spill] sm:$0xff] %v2819_v2 }
  0x9e   : > { %1697 = vrot.lane.b32.xlu1 %v1694_v63, %s2512_s17  ;;  %828 = vrot.lane.b32.xlu0 %v826_v3, %s2517_s15  ;;  %v2214_v63 = vld [vmem:[%s3779_s5 + $0x6] ss:$8 sm:$0x3]  ;;  %s2525_s17 = smov 126  }
  0x9f   : > { %2337 = vset.pattern.permute.xlu1 %v3801_v58  ;;  %v1359_v3 = vperm.slane %v2214_v63, 0 }
  0xa2   : > { %2338 = vset.pattern.permute.xlu2 %v3797_v4 }
  0xa3   : > { %1714 = vperm.xlu2 %2338, %v2765_v40  }
  0xa4   : > { %v2828_v6 = vpop.permute.xlu2 %763 }
  0xa6   : > { %1578 = vperm.xlu1 %2337, %v2775_v42   ;;  %961 = vrot.lane.b32.xlu0 %v959_v7, %s2519_s25 }
  0xab   : > { %2340 = vset.pattern.permute.xlu2 %v3799_v0 }
  0xac   : > { %v2832_v8 = vpop.permute.xlu2 %898  ;;  %678 = vperm.xlu2 %2340, %v2765_v40  }
  0xae   : > { %2339 = vset.pattern.permute.xlu1 %v3797_v4  ;;  %848 = vperm.xlu0 %2342, %v2839_v9  }
  0xaf   : > { %1710 = vperm.xlu1 %2339, %v2775_v42  }
  0xb0   : > { %v560_v11 = vpop.permute.xlu1 %559  ;;  %v491_v15 = vpop.permute.xlu0 %490 }
  0xb4   : > { %v2843_v12 = vpop.permute.xlu2 %1032  ;;  %673 = vperm.xlu2 %2340, %v2775_v42  }
  0xb6   : > { %2345 = vset.pattern.permute.xlu0 %v2509_v49 }
  0xb7   : > { %696 = vrot.lane.b32.xlu1 %v693_v13, %s2516_s22  ;;  %s2529_s22 = smov 62  }
  0xb8   : > { %v555_v14 = vpop.permute.xlu1 %554  ;;  %2343 = vset.pattern.permute.xlu1 %v2500_v10  ;;  %v486_v21 = vpop.permute.xlu0 %485  ;;  %v2210_v10 = vld [vmem:[%s3779_s5 + $0x4] ss:$8 sm:$0x3] }
  0xb9   : > { %v1093_v23 = vperm.slane %v2210_v10, 0  ;;  %v1094_v51 = vperm.slane %v2210_v10, 1 }
  0xbc   : > { %v2849_v16 = vpop.permute.xlu2 %916  ;;  %2341 = vset.pattern.permute.xlu2 %v2504_v35 }
  0xbd   : > { %714 = vperm.xlu2 %2341, %v2839_v9  }
  0xbf   : > { %830 = vrot.lane.b32.xlu1 %v827_v17, %s2517_s15  ;;  %s2530_s15 = smov 51  }
  0xc0   : > { %v2854_v18 = vpop.permute.xlu1 %636  ;;  %v2868_v29 = vpop.permute.xlu0 %621 }
  0xc1   : > { %3831 = vst [vmem:[#allocation17_spill] sm:$0xff] %v2854_v18 }
  0xc2   : > { %3832 = vst [vmem:[#allocation18_spill] sm:$0xff] %v2868_v29 }
  0xc4   : > { %v2856_v19 = vpop.permute.xlu2 %912 }
  0xc5   : > { %710 = vperm.xlu2 %2341, %v2740_v28  }
  0xc7   : > { %963 = vrot.lane.b32.xlu1 %v960_v20, %s2519_s25  ;;  %s2522_s25 = smov 49  }
  0xc8   : > { %v2862_v22 = vpop.permute.xlu1 %896 }
  0xcc   : > { %v2864_v24 = vpop.permute.xlu2 %1298 }
  0xcd   : > { %1095 = vrot.lane.b32.xlu2 %v1093_v23, %s2506_s18  ;;  %v517_v25 = vpop.f32.mrf.mxu0  ;;  %v540_v27 = vpop.f32.mrf.mxu1  ;;  %v2523_v23 = vmov 0.0  }
  0xce   : > { %2344 = vset.pattern.permute.xlu2 %v2507_v44  ;;  %v518_v26 = vadd.f32 %v517_v25, %v486_v21  ;;  %v541_v34 = vadd.f32 %v540_v27, %v486_v21  ;;  %v2882_v44 = vpop.permute.xlu0 %765  ;;  %570 = vst [vmem:[#allocation2] sm:$0xff] %v2523_v23 }
  0xcf   : > { %844 = vperm.xlu1 %2343, %v2740_v28   ;;  %573 = vst.msk [vmem:[#allocation2 + $0x10] sm:$0xff] %vm572_vm5, %v2523_v23  ;;  %v768_v58 = vsel %vm767_vm8, %v2828_v6, %v2882_v44  ;;  %vm1609_vm8 = vcmask 506880  }
  0xd0   : > { %v562_v30 = vmul.f32 %v555_v14, %v518_v26  ;;  %v2871_v31 = vpop.permute.xlu1 %1030  ;;  %vm546_vm1 = vcmp.ge.f32.partialorder %v518_v26, 0.0  ;;  %v563_v40 = vmul.f32 %v555_v14, %v541_v34  ;;  %vm547_vm3 = vcmp.ge.f32.partialorder %v541_v34, 0.0  ;;  %574 = vst [vmem:[#allocation2 + $0x18] sm:$0xff] %v2523_v23 }
  0xd1   : > { %576 = vst.msk [vmem:[#allocation2 + $0x28] sm:$0xff] %vm572_vm5, %v2523_v23 }
  0xd2   : > { %v566_v33 = vsel %vm546_vm1, %v518_v26, %v562_v30  ;;  %v567_v48 = vsel %vm547_vm3, %v541_v34, %v563_v40  ;;  %vm1077_vm1 = vcmask 785408   ;;  %vm832_vm3 = vcmask 154624  }
  0xd4   : > { %v2876_v35 = vpop.permute.xlu2 %1182 }
  0xd5   : > { %581 = vrot.lane.b32.xlu2 %v566_v33, %s2506_s18  ;;  %v520_v37 = vpop.f32.mrf.mxu0  ;;  %v543_v39 = vpop.f32.mrf.mxu1 }
  0xd6   : > { %v521_v38 = vadd.f32 %v520_v37, %v491_v15  ;;  %v544_v41 = vadd.f32 %v543_v39, %v491_v15  ;;  %v2891_v54 = vpop.permute.xlu0 %783  ;;  %v1491_v15 = vperm.slane %v2216_v57, 0 }
  0xd7   : > { %1229 = vrot.lane.b32.xlu1 %v1226_v36, %s2520_s29 }
  0xd8   : > { %v564_v42 = vmul.f32 %v560_v11, %v521_v38  ;;  %v2879_v43 = vpop.permute.xlu1 %779  ;;  %vm548_vm2 = vcmp.ge.f32.partialorder %v521_v38, 0.0  ;;  %2346 = vset.pattern.permute.xlu1 %v2509_v49  ;;  %v565_v45 = vmul.f32 %v560_v11, %v544_v41  ;;  %vm549_vm4 = vcmp.ge.f32.partialorder %v544_v41, 0.0 }
  0xd9   : > { %v1360_v11 = vperm.slane %v2214_v63, 1 }
  0xda   : > { %v568_v46 = vsel %vm548_vm2, %v521_v38, %v564_v42  ;;  %v569_v50 = vsel %vm549_vm4, %v544_v41, %v565_v45  ;;  %vm1343_vm2 = vcmask 752640   ;;  %vm810_vm4 = vcmask 1031168  }
  0xdb   : > { %585 = vrot.lane.b32.xlu0 %v568_v46, %s2506_s18 }
  0xdc   : > { %v2884_v47 = vpop.permute.xlu2 %1178 }
  0xdd   : > { %583 = vrot.lane.b32.xlu2 %v567_v48, %s2506_s18 }
  0xde   : > { %v2905_v62 = vpop.permute.xlu0 %1163 }
  0xdf   : > { %587 = vrot.lane.b32.xlu1 %v569_v50, %s2506_s18 }
  0xe0   : > { %v2889_v53 = vpop.permute.xlu1 %1165 }
  0xe3   : > { %1097 = vrot.lane.b32.xlu0 %v1094_v51, %s2506_s18  ;;  %s2531_s18 = smov 60  }
  0xe4   : > { %v2893_v49 = vpop.permute.xlu2 %1564 }
  0xe5   : > { %981 = vperm.xlu2 %2344, %v2839_v9  }
  0xe6   : > { %v2917_v7 = vpop.permute.xlu0 %1050 }
  0xe7   : > { %1110 = vperm.xlu1 %2346, %v2740_v28  }
  0xe8   : > { %v2898_v56 = vpop.permute.xlu1 %1296 }
  0xeb   : > { %1227 = vrot.lane.b32.xlu0 %v1225_v55, %s2520_s29  ;;  %s2535_s29 = smov 110  }
  0xec   : > { %v2903_v59 = vpop.permute.xlu2 %1449 }
  0xed   : > { %977 = vperm.xlu2 %2344, %v2740_v28  }
  0xee   : > { %v2926_v17 = vpop.permute.xlu0 %1429 }
  0xef   : > { %1495 = vrot.lane.b32.xlu1 %v1492_v61, %s2521_s13 }
  0xf0   : > { %v2911_v1 = vpop.permute.xlu1 %1046  ;;  %2349 = vset.pattern.permute.xlu1 %v2515_v60 }
  0xf3   : > { %1114 = vperm.xlu0 %2345, %v2839_v9  }
  0xf4   : > { %v2914_v5 = vpop.permute.xlu2 %1445 }
  0xf5   : > { %1361 = vrot.lane.b32.xlu2 %v1359_v3, %s2522_s25 }
  0xf6   : > { %2347 = vset.pattern.permute.xlu2 %v2511_v52  ;;  %v2934_v52 = vpop.permute.xlu0 %1316 }
  0xf8   : > { %v2920_v13 = vpop.permute.xlu1 %1431 }
  0xfb   : > { %1363 = vrot.lane.b32.xlu0 %v1360_v11, %s2522_s25  ;;  %s3858_s25 = sld [smem:[#allocation29_spill]] }
  0xfc   : > { %2348 = vset.pattern.permute.xlu0 %v2515_v60 }
  0xfd   : > { %v2922_v14 = vpop.permute.xlu2 %1714  ;;  %1247 = vperm.xlu2 %2347, %v2839_v9  }
  0xfe   : > { %v2942_v26 = vpop.permute.xlu0 %1695 }
 0x100   : > { %v2928_v20 = vpop.permute.xlu1 %1562 }
 0x103   : > { %1493 = vrot.lane.b32.xlu0 %v1491_v15, %s2521_s13 }
 0x106   : > { %v2930_v21 = vpop.permute.xlu2 %678  ;;  %v2948_v32 = vpop.permute.xlu0 %1582 }
 0x107   : > { %3833 = vst [vmem:[#allocation19_spill] sm:$0xff] %v2930_v21 }
 0x108   : > { %v2932_v10 = vpop.permute.xlu1 %1312 }
 0x10e   : > { %v2937_v25 = vpop.permute.xlu2 %673  ;;  %v2956_v37 = vpop.permute.xlu0 %694 }
 0x110   : > { %v2940_v60 = vpop.permute.xlu1 %1697 }
 0x116   : > { %v2961_v40 = vpop.permute.xlu0 %828 }
 0x117   : > { %v2944_v27 = vpop.permute.xlu2 %714 }
 0x118   : > { %v2946_v30 = vpop.permute.xlu1 %1578 }
 0x11e   : > { %v2980_v61 = vpop.permute.xlu0 %961 }
 0x11f   : > { %v2950_v33 = vpop.permute.xlu2 %710  ;;  %3835 = vst [vmem:[#allocation21_spill] sm:$0xff] %v2980_v61  ;;  %v901_v61 = vsel %vm900_vm9, %v2862_v22, %v2832_v8 }
 0x121   : > { %v2952_v34 = vpop.permute.xlu1 %1710 }
 0x127   : > { %v2954_v36 = vpop.permute.xlu2 %1095 }
 0x128   : > { %3834 = vst [vmem:[#allocation20_spill] sm:$0xff] %v2954_v36 }
 0x129   : > { %v2958_v38 = vpop.permute.xlu1 %696 }
 0x12f   : > { %v582_v39 = vpop.permute.xlu2 %581 }
 0x130   : > { %599 = vst.msk [vmem:[#allocation2] sm:$0xff] %vm598_vm6, %v582_v39 }
 0x131   : > { %v2963_v41 = vpop.permute.xlu1 %830 }
 0x137   : > { %v2965_v42 = vld [vmem:[#allocation2] sm:$0xff]  ;;  %v584_v45 = vpop.permute.xlu2 %583 }
 0x138   : > { %v2968_v46 = vsel %vm589_vm7, %v582_v39, %v584_v45  ;;  %601 = vst.msk [vmem:[#allocation2 + $0x10] sm:$0xff] %vm589_vm7, %v584_v45  ;;  %v1039_v48 = vmul.f32 %v2871_v31, %v2965_v42  ;;  %v772_v50 = vmul.f32 %v2828_v6, %v2965_v42  ;;  %v905_v63 = vmul.f32 %v2862_v22, %v2965_v42 }
 0x139   : > { %600 = vst [vmem:[#allocation2 + $0x8] sm:$0xff] %v2968_v46  ;;  %v2976_v51 = vpop.permute.xlu1 %963  ;;  %v1438_v4 = vmul.f32 %v2926_v17, %v2965_v42 }
 0x13a   : > { %v1053_v55 = vmul.f32 %v2911_v1, %v1039_v48  ;;  %v786_v57 = vmul.f32 %v2879_v43, %v772_v50  ;;  %v919_v39 = vmul.f32 %v2856_v19, %v905_v63  ;;  %v2999_v50 = vpop.permute.xlu0 %848 }
 0x13c   : > { %1065 = vrot.lane.b32.xlu1 %v1053_v55, %s2524_s27  ;;  %798 = vrot.lane.b32.xlu0 %v786_v57, %s2525_s17  ;;  %v1171_v55 = vmul.f32 %v2905_v62, %v2965_v42  ;;  %v1305_v57 = vmul.f32 %v2898_v56, %v2965_v42 }
 0x13f   : > { %v2986_v3 = vld [vmem:[#allocation2 + $0x10] sm:$0xff] }
 0x140   : > { %v1041_v11 = vmul.f32 %v2843_v12, %v2986_v3  ;;  %v774_v15 = vmul.f32 %v2882_v44, %v2986_v3  ;;  %v907_v63 = vmul.f32 %v2832_v8, %v2986_v3  ;;  %v1307_v0 = vmul.f32 %v2864_v24, %v2986_v3 }
 0x141   : > { %v2992_v23 = vpop.permute.xlu1 %844 }
 0x142   : > { %v1055_v45 = vmul.f32 %v2911_v1, %v1041_v11  ;;  %v788_v48 = vmul.f32 %v2879_v43, %v774_v15  ;;  %v1185_v15 = vmul.f32 %v2884_v47, %v1171_v55  ;;  %v1173_v55 = vmul.f32 %v2889_v53, %v2986_v3 }
 0x144   : > { %931 = vrot.lane.b32.xlu0 %v919_v39, %s2526_s19  ;;  %1069 = vrot.lane.b32.xlu1 %v1055_v45, %s2524_s27  ;;  %v1319_v39 = vmul.f32 %v2932_v10, %v1305_v57  ;;  %v921_v45 = vmul.f32 %v2856_v19, %v907_v63  ;;  %v1452_v63 = vmul.f32 %v2914_v5, %v1438_v4 }
 0x145   : > { %802 = vrot.lane.b32.xlu2 %v788_v48, %s2525_s17  ;;  %v773_v4 = vmul.f32 %v768_v58, %v2968_v46 }
 0x149   : > { %v3008_v11 = vpop.permute.xlu1 %1229 }
 0x14a   : > { %3836 = vst [vmem:[#allocation22_spill] sm:$0xff] %v3008_v11 }
 0x14c   : > { %1197 = vrot.lane.b32.xlu0 %v1185_v15, %s2527_s20  ;;  %1331 = vrot.lane.b32.xlu1 %v1319_v39, %s2528_s16  ;;  %v1321_v15 = vmul.f32 %v2932_v10, %v1307_v0 }
 0x14d   : > { %935 = vrot.lane.b32.xlu2 %v921_v45, %s2526_s19  ;;  %v586_v48 = vpop.permute.xlu0 %585  ;;  %v1187_v45 = vmul.f32 %v2884_v47, %v1173_v55 }
 0x14e   : > { %602 = vst.msk [vmem:[#allocation2 + $0x18] sm:$0xff] %vm598_vm6, %v586_v48  ;;  %vm965_vm6 = vcmask 269312  }
 0x151   : > { %v588_v57 = vpop.permute.xlu1 %587 }
 0x152   : > { %v3026_v39 = vsel %vm589_vm7, %v586_v48, %v588_v57  ;;  %604 = vst.msk [vmem:[#allocation2 + $0x28] sm:$0xff] %vm589_vm7, %v588_v57  ;;  %v1440_v48 = vmul.f32 %v2920_v13, %v2986_v3 }
 0x154   : > { %1464 = vrot.lane.b32.xlu0 %v1452_v63, %s2510_s14  ;;  %1335 = vrot.lane.b32.xlu1 %v1321_v15, %s2528_s16  ;;  %v3042_v63 = vpop.permute.xlu2 %981  ;;  %v1454_v21 = vmul.f32 %v2914_v5, %v1440_v48 }
 0x155   : > { %1201 = vrot.lane.b32.xlu2 %v1187_v45, %s2527_s20  ;;  %v1098_v29 = vpop.permute.xlu0 %1097  ;;  %3837 = vst [vmem:[#allocation23_spill] sm:$0xff] %v3042_v63  ;;  %v787_v45 = vmul.f32 %v2879_v43, %v773_v4  ;;  %v1035_v43 = vsel %vm1034_vm10, %v2871_v31, %v2843_v12 }
 0x156   : > { %v1099_v0 = vsel %vm589_vm7, %v2954_v36, %v1098_v29  ;;  %v1105_v57 = vmul.f32 %v1098_v29, %v2986_v3 }
 0x157   : > { %v1104_v55 = vmul.f32 %v1099_v0, %v2968_v46 }
 0x159   : > { %v3044_v15 = vld [vmem:[#allocation2 + $0x28] sm:$0xff]  ;;  %v3046_v18 = vpop.permute.xlu1 %1110 }
 0x15a   : > { %3838 = vst [vmem:[#allocation24_spill] sm:$0xff] %v3046_v18  ;;  %v3050_v2 = vmul.f32 %v3046_v18, %v1104_v55  ;;  %v3053_v36 = vmul.f32 %v3046_v18, %v1105_v57  ;;  %v1176_v63 = vmul.f32 %v2889_v53, %v3044_v15  ;;  %v906_v55 = vmul.f32 %v901_v61, %v2968_v46 }
 0x15c   : > { %3839 = vst [vmem:[#allocation25_spill] sm:$0xff] %v3050_v2  ;;  %800 = vrot.lane.b32.xlu1 %v787_v45, %s2525_s17  ;;  %v1190_v48 = vmul.f32 %v2876_v35, %v1176_v63  ;;  %v1040_v45 = vmul.f32 %v1035_v43, %v2968_v46  ;;  %v3080_v2 = vpop.permute.xlu2 %977  ;;  %v3086_v63 = vsel %vm589_vm7, %v2905_v62, %v2889_v53  ;;  %vm1209_vm7 = vcmask 769024  }
 0x15d   : > { %3840 = vst [vmem:[#allocation26_spill] sm:$0xff] %v3053_v36  ;;  %1468 = vrot.lane.b32.xlu2 %v1454_v21, %s2510_s14  ;;  %v3066_v4 = vpop.permute.xlu0 %1227  ;;  %v920_v21 = vmul.f32 %v2856_v19, %v906_v55  ;;  %v1443_v36 = vmul.f32 %v2920_v13, %v3044_v15  ;;  %v1301_v19 = vsel %vm1300_vm12, %v2898_v56, %v2864_v24  ;;  %vm1497_vm12 = vcmask 408576  }
 0x15e   : > { %3841 = vst [vmem:[#allocation27_spill] sm:$0xff] %v3066_v4  ;;  %v3072_v57 = vsel %vm1231_vm11, %v3066_v4, %v3008_v11  ;;  %1207 = vrot.lane.b32.xlu0 %v1190_v48, %s2527_s20  ;;  %v1054_v18 = vmul.f32 %v2911_v1, %v1040_v45  ;;  %v1107_v11 = vmul.f32 %v1099_v0, %v3026_v39  ;;  %v3109_v4 = vld [vmem:[#allocation2 + $0x18] sm:$0xff]  ;;  %vm741_vm11 = vcmask 1039360  }
 0x15f   : > { %v1108_v48 = vmul.f32 %v1098_v29, %v3044_v15  ;;  %v1457_v1 = vmul.f32 %v2903_v59, %v1443_v36  ;;  %v1172_v45 = vmul.f32 %v3086_v63, %v2968_v46  ;;  %v1306_v29 = vmul.f32 %v1301_v19, %v2968_v46 }
 0x160   : > { %v776_v0 = vmul.f32 %v768_v58, %v3026_v39 }
 0x161   : > { %v1320_v36 = vmul.f32 %v2932_v10, %v1306_v29  ;;  %v909_v29 = vmul.f32 %v901_v61, %v3026_v39  ;;  %v1043_v61 = vmul.f32 %v1035_v43, %v3026_v39  ;;  %v1309_v43 = vmul.f32 %v1301_v19, %v3026_v39 }
 0x162   : > { %v790_v58 = vmul.f32 %v2891_v54, %v776_v0 }
 0x163   : > { %v923_v0 = vmul.f32 %v2849_v16, %v909_v29 }
 0x164   : > { %933 = vrot.lane.b32.xlu1 %v920_v21, %s2526_s19 }
 0x165   : > { %1067 = vrot.lane.b32.xlu2 %v1054_v18, %s2524_s27  ;;  %v3093_v55 = vpop.permute.xlu0 %1114  ;;  %v1186_v18 = vmul.f32 %v2884_v47, %v1172_v45  ;;  %v775_v45 = vmul.f32 %v2828_v6, %v3109_v4  ;;  %v908_v6 = vmul.f32 %v2862_v22, %v3109_v4  ;;  %v1042_v22 = vmul.f32 %v2871_v31, %v3109_v4 }
 0x166   : > { %v3099_v21 = vmul.f32 %v3093_v55, %v1107_v11  ;;  %v3102_v53 = vmul.f32 %v3093_v55, %v1108_v48  ;;  %1474 = vrot.lane.b32.xlu0 %v1457_v1, %s2510_s14  ;;  %v3115_v11 = vsel %vm1433_vm13, %v2926_v17, %v2920_v13  ;;  %v3118_v48 = vpop.permute.xlu2 %1361  ;;  %v1308_v31 = vmul.f32 %v2898_v56, %v3109_v4 }
 0x167   : > { %v1439_v47 = vmul.f32 %v3115_v11, %v2968_v46  ;;  %v1174_v56 = vmul.f32 %v2905_v62, %v3109_v4  ;;  %v1175_v62 = vmul.f32 %v3086_v63, %v3026_v39  ;;  %v1442_v63 = vmul.f32 %v3115_v11, %v3026_v39 }
 0x169   : > { %v1453_v13 = vmul.f32 %v2914_v5, %v1439_v47  ;;  %v1057_v47 = vmul.f32 %v2917_v7, %v1043_v61  ;;  %v2218_v61 = vld [vmem:[%s3779_s5 + $0x10] ss:$8 sm:$0x3] }
 0x16c   : > { %1199 = vrot.lane.b32.xlu1 %v1186_v18, %s2527_s20  ;;  %v789_v18 = vmul.f32 %v2891_v54, %v775_v45  ;;  %v1056_v45 = vmul.f32 %v2917_v7, %v1042_v22 }
 0x16d   : > { %1333 = vrot.lane.b32.xlu2 %v1320_v36, %s2528_s16  ;;  %v3120_v1 = vpop.permute.xlu0 %1363  ;;  %v777_v36 = vmul.f32 %v2882_v44, %v3044_v15  ;;  %v910_v44 = vmul.f32 %v2832_v8, %v3044_v15  ;;  %v1044_v8 = vmul.f32 %v2843_v12, %v3044_v15 }
 0x16e   : > { %v3127_v10 = vsel %vm1365_vm14, %v3118_v48, %v3120_v1  ;;  %806 = vrot.lane.b32.xlu0 %v790_v58, %s2525_s17  ;;  %v922_v58 = vmul.f32 %v2849_v16, %v908_v6  ;;  %v1310_v6 = vmul.f32 %v2864_v24, %v3044_v15  ;;  %v1441_v24 = vmul.f32 %v2926_v17, %v3109_v4  ;;  %v3210_v17 = vpop.permute.xlu1 %1495 }
 0x16f   : > { %v791_v5 = vmul.f32 %v2891_v54, %v777_v36  ;;  %v924_v54 = vmul.f32 %v2849_v16, %v910_v44  ;;  %v1567_v16 = vsel %vm1566_vm15, %v2928_v20, %v2893_v49  ;;  %v1058_v19 = vmul.f32 %v2917_v7, %v1044_v8 }
 0x170   : > { %v1575_v29 = vmul.f32 %v1567_v16, %v3026_v39  ;;  %v1188_v7 = vmul.f32 %v2876_v35, %v1174_v56  ;;  %v1626_v44 = vperm.slane %v2218_v61, 1  ;;  %vm1631_vm14 = vcmask 416768  }
 0x171   : > { %vm623_vm15 = vcmask 138240  }
 0x172   : > { %v1589_v12 = vmul.f32 %v2948_v32, %v1575_v29 }
 0x174   : > { %1466 = vrot.lane.b32.xlu1 %v1453_v13, %s2510_s14  ;;  %v1323_v13 = vmul.f32 %v2934_v52, %v1309_v43  ;;  %v1456_v43 = vmul.f32 %v2903_v59, %v1442_v63 }
 0x175   : > { %804 = vrot.lane.b32.xlu2 %v789_v18, %s2525_s17  ;;  %v1322_v18 = vmul.f32 %v2934_v52, %v1308_v31  ;;  %v1703_v31 = vmul.f32 %v2942_v26, %v2965_v42 }
 0x176   : > { %939 = vrot.lane.b32.xlu0 %v923_v0, %s2526_s19  ;;  %v1574_v0 = vmul.f32 %v2928_v20, %v3109_v4 }
 0x178   : > { %v1588_v36 = vmul.f32 %v2948_v32, %v1574_v0  ;;  %v1572_v0 = vmul.f32 %v1567_v16, %v2968_v46 }
 0x17c   : > { %808 = vrot.lane.b32.xlu1 %v791_v5, %s2525_s17  ;;  %v3184_v5 = vpop.permute.xlu2 %1247 }
 0x17d   : > { %937 = vrot.lane.b32.xlu2 %v922_v58, %s2526_s19  ;;  %v1324_v58 = vmul.f32 %v2934_v52, %v1310_v6  ;;  %v1708_v52 = vmul.f32 %v2940_v60, %v3044_v15 }
 0x17e   : > { %1073 = vrot.lane.b32.xlu0 %v1057_v47, %s2524_s27  ;;  %v1189_v47 = vmul.f32 %v2876_v35, %v1175_v62  ;;  %v1455_v35 = vmul.f32 %v2903_v59, %v1441_v24  ;;  %v699_v62 = vsel %vm698_vm0, %v2956_v37, %v2958_v38  ;;  %vm1008_vm0 = vcmask 916480  }
 0x17f   : > { %v1722_v11 = vmul.f32 %v2922_v14, %v1708_v52 }
 0x184   : > { %941 = vrot.lane.b32.xlu1 %v924_v54, %s2526_s19  ;;  %v3842_v54 = vmov 7   ;;  %s3859_s19 = smov %s3858_s25 }
 0x185   : > { %1071 = vrot.lane.b32.xlu2 %v1056_v45, %s2524_s27  ;;  %v3212_v45 = vpop.permute.xlu0 %1493 }
 0x186   : > { %1339 = vrot.lane.b32.xlu0 %v1323_v13, %s2528_s16  ;;  %v1576_v13 = vmul.f32 %v2893_v49, %v3044_v15 }
 0x188   : > { %v1590_v59 = vmul.f32 %v2948_v32, %v1576_v13 }
 0x18c   : > { %1075 = vrot.lane.b32.xlu1 %v1058_v19, %s2524_s27 }
 0x18d   : > { %1337 = vrot.lane.b32.xlu2 %v1322_v18, %s2528_s16  ;;  %v1717_v18 = vmul.f32 %v2952_v34, %v1703_v31 }
 0x18e   : > { %1605 = vrot.lane.b32.xlu0 %v1589_v12, %s2529_s22  ;;  %v1571_v12 = vmul.f32 %v2928_v20, %v2965_v42  ;;  %v1573_v20 = vmul.f32 %v2893_v49, %v2986_v3  ;;  %v1699_v49 = vsel %vm572_vm5, %v2942_v26, %v2940_v60  ;;  %vm943_vm5 = vcmask 1014784  }
 0x190   : > { %v1585_v32 = vmul.f32 %v2946_v30, %v1571_v12 }
 0x194   : > { %1203 = vrot.lane.b32.xlu1 %v1188_v7, %s2527_s20  ;;  %v1586_v7 = vmul.f32 %v2946_v30, %v1572_v0 }
 0x195   : > { %1603 = vrot.lane.b32.xlu2 %v1588_v36, %s2529_s22 }
 0x196   : > { %1381 = vperm.xlu0 %2348, %v2839_v9  }
 0x19c   : > { %1341 = vrot.lane.b32.xlu1 %v1324_v58, %s2528_s16  ;;  %v1625_v58 = vperm.slane %v2218_v61, 0  ;;  %s2533_s16 = smov 112  }
 0x19d   : > { %1205 = vrot.lane.b32.xlu2 %v1189_v47, %s2527_s20  ;;  %v1587_v47 = vmul.f32 %v2946_v30, %v1573_v20  ;;  %v1707_v30 = vmul.f32 %v1699_v49, %v3026_v39 }
 0x19e   : > { %1629 = vrot.lane.b32.xlu0 %v1626_v44, %s2530_s15  ;;  %v707_v44 = vmul.f32 %v699_v62, %v3026_v39 }
 0x19f   : > { %v3198_v22 = vpop.permute.xlu2 %802  ;;  %2351 = vset.pattern.permute.xlu0 %v3842_v54 }
 0x1a0   : > { %v721_v63 = vmul.f32 %v2944_v27, %v707_v44  ;;  %v1704_v44 = vmul.f32 %v1699_v49, %v2968_v46 }
 0x1a2   : > { %v1718_v49 = vmul.f32 %v2952_v34, %v1704_v44  ;;  %v3845_v44 = vld [vmem:[#allocation21_spill] sm:$0xff] }
 0x1a4   : > { %1470 = vrot.lane.b32.xlu1 %v1455_v35, %s2510_s14 }
 0x1a5   : > { %1472 = vrot.lane.b32.xlu2 %v1456_v43, %s2510_s14  ;;  %s2532_s14 = smov 127  }
 0x1a6   : > { %1739 = vrot.lane.b32.xlu0 %v1722_v11, %s2531_s18  ;;  %v3843_v11 = vmov 0  }
 0x1a7   : > { %v3217_v8 = vpop.permute.xlu2 %935 }
 0x1ac   : > { %1607 = vrot.lane.b32.xlu1 %v1590_v59, %s2529_s22  ;;  %v704_v59 = vmul.f32 %v699_v62, %v2968_v46 }
 0x1ad   : > { %1243 = vperm.xlu2 %2347, %v2740_v28  }
 0x1ae   : > { %v1066_v19 = vpop.permute.xlu1 %1065  ;;  %v799_v29 = vpop.permute.xlu0 %798  ;;  %1729 = vrot.lane.b32.xlu0 %v1717_v18, %s2531_s18 }
 0x1af   : > { %v3228_v56 = vpop.permute.xlu2 %1201 }
 0x1b4   : > { %1597 = vrot.lane.b32.xlu1 %v1585_v32, %s2529_s22  ;;  %v3281_v32 = vld [vmem:[%s3779_s5 + $0x11] ss:$8 sm:$0x3] }
 0x1b5   : > { %1599 = vrot.lane.b32.xlu2 %v1586_v7, %s2529_s22  ;;  %v663_v20 = vperm.slane %v3281_v32, 0  ;;  %v664_v62 = vperm.slane %v3281_v32, 1 }
 0x1b6   : > { %v3236_v36 = vpop.permute.xlu0 %931  ;;  %v1070_v6 = vpop.permute.xlu1 %1069  ;;  %2350 = vset.pattern.permute.xlu2 %v3842_v54  ;;  %1509 = vperm.xlu0 %2351, %v2740_v28   ;;  %v1706_v54 = vmul.f32 %v2942_v26, %v3109_v4  ;;  %v1721_v26 = vmul.f32 %v2922_v14, %v1707_v30 }
 0x1b7   : > { %v3241_v16 = vpop.permute.xlu2 %1468  ;;  %v668_v30 = vmul.f32 %v664_v62, %v2968_v46 }
 0x1b8   : > { %v1720_v13 = vmul.f32 %v2922_v14, %v1706_v54  ;;  %v833_v14 = vsel %vm832_vm3, %v2961_v40, %v2963_v41  ;;  %vm1274_vm3 = vcmask 900096  }
 0x1bc   : > { %1601 = vrot.lane.b32.xlu1 %v1587_v47, %s2529_s22  ;;  %s2534_s22 = smov 111  }
 0x1bd   : > { %1627 = vrot.lane.b32.xlu2 %v1625_v58, %s2530_s15  ;;  %s3857_s15 = sld [smem:[#allocation11_spill]] }
 0x1be   : > { %v1332_v24 = vpop.permute.xlu1 %1331  ;;  %v3257_v35 = vpop.permute.xlu0 %1197  ;;  %737 = vrot.lane.b32.xlu0 %v721_v63, %s2532_s14 }
 0x1bf   : > { %v1068_v61 = vpop.permute.xlu2 %1067  ;;  %2356 = vset.pattern.permute.xlu0 %v3843_v11 }
 0x1c0   : > { %v1078_v52 = vsel %vm1077_vm1, %v1066_v19, %v1068_v61  ;;  %v1079_v43 = vsel %vm1077_vm1, %v1068_v61, %v1070_v6  ;;  %v718_v19 = vmul.f32 %v2950_v33, %v704_v59  ;;  %v841_v6 = vmul.f32 %v833_v14, %v3026_v39 }
 0x1c1   : > { %v667_v61 = vmul.f32 %v663_v20, %v2965_v42  ;;  %v682_v59 = vmul.f32 %v2937_v25, %v668_v30 }
 0x1c2   : > { %v855_v47 = vmul.f32 %v2999_v50, %v841_v6 }
 0x1c4   : > { %1735 = vrot.lane.b32.xlu1 %v1720_v13, %s2531_s18 }
 0x1c5   : > { %1737 = vrot.lane.b32.xlu2 %v1721_v26, %s2531_s18  ;;  %v3844_v26 = vmov 8  }
 0x1c6   : > { %v1336_v31 = vpop.permute.xlu1 %1335  ;;  %731 = vrot.lane.b32.xlu0 %v718_v19, %s2532_s14  ;;  %v3283_v7 = vpop.permute.xlu0 %1464 }
 0x1c7   : > { %v1334_v18 = vpop.permute.xlu2 %1333 }
 0x1c8   : > { %v3270_v12 = vsel %vm1343_vm2, %v1332_v24, %v1334_v18  ;;  %v3273_v0 = vsel %vm1343_vm2, %v1334_v18, %v1336_v31 }
 0x1cc   : > { %1377 = vperm.xlu1 %2349, %v2740_v28   ;;  %v1705_v28 = vmul.f32 %v2940_v60, %v2986_v3  ;;  %v838_v60 = vmul.f32 %v833_v14, %v2968_v46 }
 0x1cd   : > { %1513 = vperm.xlu2 %2350, %v2839_v9  }
 0x1ce   : > { %v801_v58 = vpop.permute.xlu1 %800  ;;  %871 = vrot.lane.b32.xlu0 %v855_v47, %s2525_s17  ;;  %v852_v6 = vmul.f32 %v2992_v23, %v838_v60 }
 0x1cf   : > { %v811_v24 = vsel %vm810_vm4, %v799_v29, %v801_v58  ;;  %v812_v63 = vsel %vm810_vm4, %v801_v58, %v3198_v22  ;;  %v805_v54 = vpop.permute.xlu2 %804  ;;  %v1719_v29 = vmul.f32 %v2952_v34, %v1705_v28  ;;  %v681_v22 = vmul.f32 %v2937_v25, %v667_v61 }
 0x1d0   : > { %v3302_v13 = vpop.permute.xlu0 %1207  ;;  %v820_v19 = vadd.f32 %v812_v63, %v682_v59  ;;  %v706_v59 = vmul.f32 %v2956_v37, %v3109_v4 }
 0x1d1   : > { %v819_v31 = vadd.f32 %v811_v24, %v681_v22  ;;  %v966_v24 = vsel %vm965_vm6, %v3845_v44, %v2976_v51 }
 0x1d2   : > { %v974_v30 = vmul.f32 %v966_v24, %v3026_v39 }
 0x1d4   : > { %1731 = vrot.lane.b32.xlu1 %v1718_v49, %s2531_s18  ;;  %v3846_v49 = vld [vmem:[#allocation23_spill] sm:$0xff] }
 0x1d5   : > { %1733 = vrot.lane.b32.xlu2 %v1719_v29, %s2531_s18  ;;  %2352 = vset.pattern.permute.xlu1 %v3844_v26  ;;  %v988_v29 = vmul.f32 %v3846_v49, %v974_v30  ;;  %s2198_s18 = sshll.u32 %s2685_s23, 5 }
 0x1d6   : > { %v934_v18 = vpop.permute.xlu1 %933  ;;  %2353 = vset.pattern.permute.xlu2 %v3844_v26  ;;  %865 = vrot.lane.b32.xlu0 %v852_v6, %s2525_s17  ;;  %s460_s21 = scalar_lea.vmem [#allocation6], %s2198_s18 }
 0x1d7   : > { %v944_v25 = vsel %vm943_vm5, %v3236_v36, %v934_v18  ;;  %v945_v34 = vsel %vm943_vm5, %v934_v18, %v3217_v8  ;;  %v938_v58 = vpop.permute.xlu2 %937  ;;  %v2395_v8 = vld [vmem:[%s3778_s4] sm:$0xff] }
 0x1d8   : > { %v952_v14 = vadd.f32 %v944_v25, %v819_v31  ;;  %v953_v47 = vadd.f32 %v945_v34, %v820_v19  ;;  %v3321_v63 = vpop.permute.xlu0 %1474  ;;  %v669_v25 = vmul.f32 %v663_v20, %v3109_v4  ;;  %v703_v20 = vmul.f32 %v2956_v37, %v2965_v42 }
 0x1da   : > { %v1086_v28 = vadd.f32 %v1078_v52, %v952_v14  ;;  %v1087_v61 = vadd.f32 %v1079_v43, %v953_v47  ;;  %v708_v47 = vmul.f32 %v2958_v38, %v3044_v15 }
 0x1dc   : > { %1647 = vperm.xlu1 %2352, %v2839_v9  }
 0x1dd   : > { %1643 = vperm.xlu2 %2353, %v2395_v8   ;;  %v722_v8 = vmul.f32 %v2944_v27, %v708_v47 }
 0x1de   : > { %v1200_v36 = vpop.permute.xlu1 %1199  ;;  %1004 = vrot.lane.b32.xlu0 %v988_v29, %s2533_s16 }
 0x1df   : > { %v1210_v22 = vsel %vm1209_vm7, %v3257_v35, %v1200_v36  ;;  %v1211_v52 = vsel %vm1209_vm7, %v1200_v36, %v3228_v56  ;;  %v1072_v43 = vpop.permute.xlu2 %1071  ;;  %v720_v35 = vmul.f32 %v2944_v27, %v706_v59  ;;  %v971_v56 = vmul.f32 %v966_v24, %v2968_v46  ;;  %v3847_v24 = vld [vmem:[#allocation19_spill] sm:$0xff] }
 0x1e0   : > { %v1218_v60 = vadd.f32 %v1210_v22, %v1086_v28  ;;  %v1219_v26 = vadd.f32 %v1211_v52, %v1087_v61  ;;  %v807_v31 = vpop.permute.xlu0 %806  ;;  %v840_v52 = vmul.f32 %v2961_v40, %v3109_v4  ;;  %v705_v59 = vmul.f32 %v2958_v38, %v2986_v3 }
 0x1e1   : > { %v813_v6 = vsel %vm810_vm4, %v805_v54, %v807_v31  ;;  %v985_v34 = vmul.f32 %v3080_v2, %v971_v56  ;;  %v837_v56 = vmul.f32 %v2961_v40, %v2965_v42 }
 0x1e2   : > { %v1352_v19 = vadd.f32 %v3270_v12, %v1218_v60  ;;  %v1353_v18 = vadd.f32 %v3273_v0, %v1219_v26  ;;  %v854_v26 = vmul.f32 %v2999_v50, %v840_v52 }
 0x1e4   : > { %2354 = vset.pattern.permute.xlu1 %v3843_v11 }
 0x1e5   : > { %735 = vrot.lane.b32.xlu2 %v720_v35, %s2532_s14  ;;  %641 = vperm.xlu1 %2354, %v2839_v9   ;;  %v683_v9 = vmul.f32 %v3847_v24, %v669_v25  ;;  %v1240_v25 = vmul.f32 %v3072_v57, %v3026_v39 }
 0x1e6   : > { %v1467_v14 = vpop.permute.xlu1 %1466  ;;  %2355 = vset.pattern.permute.xlu2 %v3843_v11  ;;  %998 = vrot.lane.b32.xlu0 %v985_v34, %s2533_s16 }
 0x1e7   : > { %v1476_v12 = vsel %vm1433_vm13, %v3283_v7, %v1467_v14  ;;  %v1477_v0 = vsel %vm1433_vm13, %v1467_v14, %v3241_v16  ;;  %v1338_v54 = vpop.permute.xlu2 %1337  ;;  %v821_v11 = vadd.f32 %v813_v6, %v683_v9  ;;  %v717_v16 = vmul.f32 %v2950_v33, %v703_v20 }
 0x1e8   : > { %v3356_v28 = vadd.f32 %v1476_v12, %v1352_v19  ;;  %v3358_v61 = vadd.f32 %v1477_v0, %v1353_v18  ;;  %v940_v7 = vpop.permute.xlu0 %939  ;;  %v851_v12 = vmul.f32 %v2992_v23, %v837_v56  ;;  %v1254_v20 = vmul.f32 %v3184_v5, %v1240_v25 }
 0x1e9   : > { %v946_v30 = vsel %vm943_vm5, %v938_v58, %v940_v7  ;;  %v670_v58 = vmul.f32 %v664_v62, %v3026_v39 }
 0x1ea   : > { %v954_v37 = vadd.f32 %v946_v30, %v821_v11 }
 0x1eb   : > { %v684_v19 = vmul.f32 %v3847_v24, %v670_v58  ;;  %v973_v24 = vmul.f32 %v3845_v44, %v3109_v4 }
 0x1ed   : > { %729 = vrot.lane.b32.xlu2 %v717_v16, %s2532_s14  ;;  %739 = vrot.lane.b32.xlu1 %v722_v8, %s2532_s14  ;;  %v987_v16 = vmul.f32 %v3846_v49, %v973_v24 }
 0x1ee   : > { %v809_v36 = vpop.permute.xlu1 %808  ;;  %1137 = vrot.lane.b32.xlu0 %v3099_v21, %s2534_s22  ;;  %v842_v21 = vmul.f32 %v2963_v41, %v3044_v15 }
 0x1ef   : > { %v814_v29 = vsel %vm810_vm4, %v807_v31, %v809_v36  ;;  %v1604_v22 = vpop.permute.xlu2 %1603  ;;  %v719_v31 = vmul.f32 %v2950_v33, %v705_v59  ;;  %v3848_v33 = vld [vmem:[#allocation25_spill] sm:$0xff] }
 0x1f0   : > { %v1074_v27 = vpop.permute.xlu0 %1073  ;;  %v822_v38 = vadd.f32 %v814_v29, %v684_v19  ;;  %v856_v0 = vmul.f32 %v2999_v50, %v842_v21  ;;  %v839_v50 = vmul.f32 %v2963_v41, %v2986_v3  ;;  %v975_v41 = vmul.f32 %v2976_v51, %v3044_v15 }
 0x1f1   : > { %v1080_v60 = vsel %vm1077_vm1, %v1072_v43, %v1074_v27 }
 0x1f2   : > { %v1088_v18 = vadd.f32 %v1080_v60, %v954_v37  ;;  %v853_v8 = vmul.f32 %v2992_v23, %v839_v50  ;;  %v970_v23 = vmul.f32 %v3845_v44, %v2965_v42  ;;  %v1374_v60 = vmul.f32 %v3127_v10, %v3026_v39  ;;  %v3853_v50 = vld [vmem:[#allocation22_spill] sm:$0xff] }
 0x1f5   : > { %869 = vrot.lane.b32.xlu2 %v854_v26, %s2525_s17  ;;  %733 = vrot.lane.b32.xlu1 %v719_v31, %s2532_s14  ;;  %s2233_s14 = sshll.u32 %s3857_s15, 5 }
 0x1f6   : > { %v942_v32 = vpop.permute.xlu1 %941  ;;  %1131 = vrot.lane.b32.xlu0 %v3848_v33, %s2534_s22 }
 0x1f7   : > { %v947_v62 = vsel %vm943_vm5, %v940_v7, %v942_v32  ;;  %v1206_v6 = vpop.permute.xlu2 %1205  ;;  %v3849_v32 = vld [vmem:[#allocation20_spill] sm:$0xff] }
 0x1f8   : > { %v955_v43 = vadd.f32 %v947_v62, %v822_v38  ;;  %v1213_v35 = vsel %vm1209_vm7, %v1206_v6, %v3302_v13  ;;  %v1340_v34 = vpop.permute.xlu0 %1339  ;;  %v972_v38 = vmul.f32 %v2976_v51, %v2986_v3  ;;  %v1103_v25 = vmul.f32 %v3849_v32, %v2965_v42 }
 0x1f9   : > { %v1346_v14 = vsel %vm1343_vm2, %v1338_v54, %v1340_v34 }
 0x1fa   : > { %v986_v21 = vmul.f32 %v3080_v2, %v972_v38 }
 0x1fd   : > { %863 = vrot.lane.b32.xlu2 %v851_v12, %s2525_s17  ;;  %873 = vrot.lane.b32.xlu1 %v856_v0, %s2525_s17  ;;  %v3851_v0 = vld [vmem:[#allocation27_spill] sm:$0xff] }
 0x1fe   : > { %v1076_v13 = vpop.permute.xlu1 %1075  ;;  %1270 = vrot.lane.b32.xlu0 %v1254_v20, %s2535_s29 }
 0x1ff   : > { %v1081_v47 = vsel %vm1077_vm1, %v1074_v27, %v1076_v13  ;;  %v1473_v40 = vpop.permute.xlu2 %1472  ;;  %v989_v27 = vmul.f32 %v3846_v49, %v975_v41  ;;  %v1106_v49 = vmul.f32 %v3849_v32, %v3109_v4  ;;  %v1239_v13 = vmul.f32 %v3851_v0, %v3109_v4 }
 0x200   : > { %v1089_v9 = vadd.f32 %v1081_v47, %v955_v43  ;;  %v1479_v54 = vsel %vm1433_vm13, %v1473_v40, %v3321_v63  ;;  %v1606_v11 = vpop.permute.xlu0 %1605  ;;  %v1237_v63 = vmul.f32 %v3072_v57, %v2968_v46  ;;  %v984_v57 = vmul.f32 %v3080_v2, %v970_v23  ;;  %v3850_v2 = vld [vmem:[#allocation24_spill] sm:$0xff] }
 0x201   : > { %v1612_v30 = vsel %vm1609_vm8, %v1604_v22, %v1606_v11  ;;  %v1120_v43 = vmul.f32 %v3093_v55, %v1106_v49  ;;  %v1117_v12 = vmul.f32 %v3850_v2, %v1103_v25  ;;  %v1238_v23 = vmul.f32 %v3853_v50, %v2986_v3 }
 0x202   : > { %v1221_v7 = vadd.f32 %v1213_v35, %v1089_v9  ;;  %v1253_v9 = vmul.f32 %v3184_v5, %v1239_v13 }
 0x205   : > { %1002 = vrot.lane.b32.xlu2 %v987_v16, %s2533_s16  ;;  %867 = vrot.lane.b32.xlu1 %v853_v8, %s2525_s17  ;;  %v1236_v8 = vmul.f32 %v3851_v0, %v2965_v42  ;;  %s2536_s17 = smov 95  }
 0x206   : > { %v1204_v37 = vpop.permute.xlu1 %1203 }
 0x207   : > { %v1212_v36 = vsel %vm1209_vm7, %v1204_v37, %v1206_v6  ;;  %v3415_v29 = vpop.permute.xlu2 %1243 }
 0x208   : > { %v1220_v22 = vadd.f32 %v1212_v36, %v1088_v18  ;;  %v1251_v52 = vmul.f32 %v3415_v29, %v1237_v63  ;;  %v3423_v59 = vpop.permute.xlu0 %1381  ;;  %v1250_v36 = vmul.f32 %v3415_v29, %v1236_v8 }
 0x209   : > { %v1388_v19 = vmul.f32 %v3423_v59, %v1374_v60 }
 0x20a   : > { %1264 = vrot.lane.b32.xlu0 %v1251_v52, %s2535_s29  ;;  %v1354_v58 = vadd.f32 %v1346_v14, %v1220_v22 }
 0x20d   : > { %996 = vrot.lane.b32.xlu2 %v984_v57, %s2533_s16  ;;  %1006 = vrot.lane.b32.xlu1 %v989_v27, %s2533_s16  ;;  %v1252_v57 = vmul.f32 %v3415_v29, %v1238_v23  ;;  %v1371_v29 = vmul.f32 %v3127_v10, %v2968_v46 }
 0x20e   : > { %v1342_v26 = vpop.permute.xlu1 %1341 }
 0x20f   : > { %v1347_v31 = vsel %vm1343_vm2, %v1340_v34, %v1342_v26  ;;  %v1600_v44 = vpop.permute.xlu2 %1599  ;;  %vm1141_vm2 = vcmask 908288  }
 0x210   : > { %v1355_v18 = vadd.f32 %v1347_v31, %v1221_v7  ;;  %v3438_v62 = vpop.permute.xlu0 %1629  ;;  %v1241_v7 = vmul.f32 %v3853_v50, %v3044_v15 }
 0x212   : > { %1404 = vrot.lane.b32.xlu0 %v1388_v19, %s2524_s27  ;;  %v1487_v6 = vadd.f32 %v1479_v54, %v1355_v18  ;;  %v3852_v54 = vld [vmem:[#allocation26_spill] sm:$0xff]  ;;  %v1255_v37 = vmul.f32 %v3184_v5, %v1241_v7  ;;  %v1373_v5 = vmul.f32 %v3118_v48, %v3109_v4  ;;  %v1370_v19 = vmul.f32 %v3118_v48, %v2965_v42 }
 0x213   : > { %v1498_v48 = vsel %vm1497_vm12, %v3212_v45, %v3210_v17 }
 0x214   : > { %v1387_v27 = vmul.f32 %v3423_v59, %v1373_v5 }
 0x215   : > { %1135 = vrot.lane.b32.xlu2 %v1120_v43, %s2534_s22  ;;  %1000 = vrot.lane.b32.xlu1 %v986_v21, %s2533_s16  ;;  %v1505_v43 = vmul.f32 %v3212_v45, %v3109_v4 }
 0x216   : > { %v1471_v35 = vpop.permute.xlu1 %1470 }
 0x217   : > { %v1478_v33 = vsel %vm1433_vm13, %v1471_v35, %v1473_v40  ;;  %v3445_v51 = vpop.permute.xlu2 %1627  ;;  %v1506_v35 = vmul.f32 %v1498_v48, %v3026_v39  ;;  %vm1741_vm13 = vcmask 490496  }
 0x218   : > { %v1486_v56 = vadd.f32 %v1478_v33, %v1354_v58  ;;  %v3449_v34 = vpop.permute.xlu0 %1739 }
 0x21a   : > { %v3451_v14 = vadd.f32 %v1612_v30, %v1486_v56 }
 0x21d   : > { %1129 = vrot.lane.b32.xlu2 %v1117_v12, %s2534_s22  ;;  %1139 = vrot.lane.b32.xlu1 %v3102_v53, %s2534_s22  ;;  %v1507_v12 = vmul.f32 %v3210_v17, %v3044_v15 }
 0x21e   : > { %v1608_v55 = vpop.permute.xlu1 %1607 }
 0x21f   : > { %v1613_v20 = vsel %vm1609_vm8, %v1606_v11, %v1608_v55  ;;  %v3460_v47 = vpop.permute.xlu2 %1737 }
 0x220   : > { %v3462_v40 = vadd.f32 %v1613_v20, %v1487_v6  ;;  %v3464_v24 = vpop.permute.xlu0 %1729  ;;  %v1745_v20 = vsel %vm1741_vm13, %v3460_v47, %v3449_v34  ;;  %v1777_v34 = vld [vmem:[%s3780_s6 + $0x18] sm:$0xff] }
 0x225   : > { %1268 = vrot.lane.b32.xlu2 %v1253_v9, %s2535_s29  ;;  %1133 = vrot.lane.b32.xlu1 %v3852_v54, %s2534_s22  ;;  %v1753_v54 = vadd.f32 %v1745_v20, %v3462_v40  ;;  %v3855_v40 = vld [vmem:[#allocation17_spill] sm:$0xff] }
 0x226   : > { %v1598_v53 = vpop.permute.xlu1 %1597 }
 0x227   : > { %v1610_v30 = vsel %vm1609_vm8, %v1598_v53, %v1600_v44  ;;  %v1514_v11 = vpop.permute.xlu2 %1513 }
 0x228   : > { %v3474_v16 = vadd.f32 %v1610_v30, %v3356_v28  ;;  %v3478_v63 = vpop.permute.xlu0 %1509  ;;  %v1520_v56 = vmul.f32 %v1514_v11, %v1506_v35  ;;  %v1521_v0 = vmul.f32 %v1514_v11, %v1507_v12  ;;  %v3854_v30 = vld [vmem:[#allocation16_spill] sm:$0xff] }
 0x22d   : > { %1262 = vrot.lane.b32.xlu2 %v1250_v36, %s2535_s29  ;;  %1272 = vrot.lane.b32.xlu1 %v1255_v37, %s2535_s29  ;;  %v631_v36 = vmul.f32 %v3854_v30, %v3109_v4 }
 0x22e   : > { %v1602_v41 = vpop.permute.xlu1 %1601 }
 0x22f   : > { %v1611_v22 = vsel %vm1609_vm8, %v1600_v44, %v1602_v41  ;;  %v3485_v52 = vpop.permute.xlu2 %1733 }
 0x230   : > { %v3488_v28 = vadd.f32 %v1611_v22, %v3358_v61  ;;  %v3494_v58 = vpop.permute.xlu0 %737  ;;  %v1375_v61 = vmul.f32 %v3120_v1, %v3044_v15 }
 0x232   : > { %v1389_v44 = vmul.f32 %v3423_v59, %v1375_v61  ;;  %v1372_v59 = vmul.f32 %v3120_v1, %v2986_v3  ;;  %v1519_v1 = vmul.f32 %v1514_v11, %v1505_v43  ;;  %v628_v11 = vmul.f32 %v3854_v30, %v2965_v42 }
 0x234   : > { %v644_v37 = vmul.f32 %v3855_v40, %v628_v11 }
 0x235   : > { %1402 = vrot.lane.b32.xlu2 %v1387_v27, %s2524_s27  ;;  %1266 = vrot.lane.b32.xlu1 %v1252_v57, %s2535_s29  ;;  %s2116_s29 = scalar_lea.hbm %s3858_s25, %s2233_s14  ;;  %s2449_s14 = scalar_lea.hbm %s3859_s19, 64 }
 0x236   : > { %v1736_v60 = vpop.permute.xlu1 %1735 }
 0x237   : > { %v3500_v26 = vpop.permute.xlu2 %1643  ;;  %v1744_v13 = vsel %vm1741_vm13, %v1736_v60, %v3460_v47  ;;  %v1503_v47 = vmul.f32 %v1498_v48, %v2968_v46  ;;  %v1504_v46 = vmul.f32 %v3210_v17, %v2986_v3  ;;  %v1632_v60 = vsel %vm1631_vm14, %v3445_v51, %v3438_v62 }
 0x238   : > { %v3504_v31 = vpop.permute.xlu0 %731  ;;  %v1752_v53 = vadd.f32 %v1744_v13, %v3451_v14  ;;  %v1502_v14 = vmul.f32 %v3212_v45, %v2965_v42 }
 0x239   : > { %v1517_v22 = vmul.f32 %v3478_v63, %v1503_v47 }
 0x23a   : > { %v1516_v41 = vmul.f32 %v3478_v63, %v1502_v14 }
 0x23d   : > { %1406 = vrot.lane.b32.xlu1 %v1389_v44, %s2524_s27  ;;  %v1518_v44 = vmul.f32 %v3478_v63, %v1504_v46 }
 0x23e   : > { %v1378_v18 = vpop.permute.xlu1 %1377 }
 0x23f   : > { %v1384_v38 = vmul.f32 %v1378_v18, %v1370_v19  ;;  %v1385_v32 = vmul.f32 %v1378_v18, %v1371_v29  ;;  %v736_v49 = vpop.permute.xlu2 %735  ;;  %v1386_v21 = vmul.f32 %v1378_v18, %v1372_v59  ;;  %v3856_v19 = vld [vmem:[#allocation18_spill] sm:$0xff] }
 0x240   : > { %v744_v6 = vsel %vm741_vm11, %v736_v49, %v3494_v58  ;;  %v3520_v10 = vpop.permute.xlu0 %871  ;;  %v624_v29 = vsel %vm623_vm15, %v3854_v30, %v3856_v19  ;;  %v633_v18 = vmul.f32 %v3856_v19, %v3044_v15 }
 0x241   : > { %1398 = vrot.lane.b32.xlu0 %v1385_v32, %s2524_s27  ;;  %1396 = vrot.lane.b32.xlu2 %v1384_v38, %s2524_s27  ;;  %v1639_v38 = vmul.f32 %v3445_v51, %v3109_v4  ;;  %v1640_v32 = vmul.f32 %v1632_v60, %v3026_v39  ;;  %v632_v49 = vmul.f32 %v624_v29, %v3026_v39 }
 0x245   : > { %1400 = vrot.lane.b32.xlu1 %v1386_v21, %s2524_s27  ;;  %s2105_s27 = scalar_lea.sflag [#allocation5], %s2685_s23 }
 0x246   : > { %v3526_v33 = vpop.permute.xlu1 %1731 }
 0x247   : > { %v730_v25 = vpop.permute.xlu2 %729  ;;  %v1742_v12 = vsel %vm1741_vm13, %v3464_v24, %v3526_v33 }
 0x248   : > { %v742_v2 = vsel %vm741_vm11, %v730_v25, %v3504_v31  ;;  %v3534_v55 = vpop.permute.xlu0 %865 }
 0x249   : > { %1536 = vrot.lane.b32.xlu0 %v1520_v56, %s2536_s17  ;;  %1534 = vrot.lane.b32.xlu2 %v1519_v1, %s2536_s17  ;;  %v752_v23 = vadd.f32 %v742_v2, %v644_v37  ;;  %v1641_v56 = vmul.f32 %v3438_v62, %v3044_v15  ;;  %v1750_v15 = vadd.f32 %v1742_v12, %v3474_v16  ;;  %v2396_v16 = vld [vmem:[#allocation2] sm:$0xff] }
 0x24d   : > { %1538 = vrot.lane.b32.xlu1 %v1521_v0, %s2536_s17  ;;  %v1743_v0 = vsel %vm1741_vm13, %v3526_v33, %v3485_v52  ;;  %v1776_v52 = vld [vmem:[%s3780_s6 + $0x10] sm:$0xff]  ;;  %v1825_v33 = vld [vmem:[%s3781_s7 + $0x18] sm:$0xff] }
 0x24e   : > { %v1648_v9 = vpop.permute.xlu1 %1647  ;;  %v1751_v13 = vadd.f32 %v1743_v0, %v3488_v28  ;;  %v1636_v28 = vmul.f32 %v2396_v16, %v3445_v51 }
 0x24f   : > { %v870_v50 = vpop.permute.xlu2 %869  ;;  %v1654_v59 = vmul.f32 %v1648_v9, %v1640_v32  ;;  %v1655_v2 = vmul.f32 %v1648_v9, %v1641_v56 }
 0x250   : > { %v877_v7 = vsel %vm810_vm4, %v870_v50, %v3520_v10  ;;  %v3550_v8 = vpop.permute.xlu0 %1004  ;;  %v2397_v50 = vld [vmem:[#allocation2 + $0x10] sm:$0xff] }
 0x251   : > { %1764 = vrot.lane.b32.xlu0 %v1753_v54, %s2501_s30  ;;  %1762 = vrot.lane.b32.xlu2 %v1752_v53, %s2501_s30 }
 0x255   : > { %1795 = vperm.xlu1 %2354, %v1777_v34   ;;  %v2398_v34 = vld [vmem:[#allocation2 + $0x8] sm:$0xff] }
 0x256   : > { %v629_v14 = vmul.f32 %v2398_v34, %v624_v29 }
 0x257   : > { %v864_v5 = vpop.permute.xlu2 %863  ;;  %v642_v57 = vpop.permute.xlu1 %641 }
 0x258   : > { %v875_v27 = vsel %vm810_vm4, %v864_v5, %v3534_v55  ;;  %v647_v42 = vmul.f32 %v642_v57, %v631_v36  ;;  %v3577_v3 = vpop.permute.xlu0 %998  ;;  %v649_v63 = vmul.f32 %v642_v57, %v633_v18  ;;  %v648_v48 = vmul.f32 %v642_v57, %v632_v49 }
 0x259   : > { %v885_v45 = vadd.f32 %v875_v27, %v752_v23  ;;  %1530 = vrot.lane.b32.xlu0 %v1517_v22, %s2536_s17  ;;  %1528 = vrot.lane.b32.xlu2 %v1516_v41, %s2536_s17  ;;  %v1637_v41 = vmul.f32 %v2398_v34, %v1632_v60  ;;  %v1638_v27 = vmul.f32 %v2397_v50, %v3438_v62 }
 0x25a   : > { %v755_v61 = vadd.f32 %v744_v6, %v647_v42  ;;  %v1653_v6 = vmul.f32 %v1648_v9, %v1639_v38  ;;  %v645_v42 = vmul.f32 %v3855_v40, %v629_v14  ;;  %v1824_v38 = vld [vmem:[%s3781_s7 + $0x10] sm:$0xff] }
 0x25b   : > { %v1651_v5 = vmul.f32 %v3500_v26, %v1637_v41 }
 0x25c   : > { %v888_v17 = vadd.f32 %v877_v7, %v755_v61  ;;  %v630_v7 = vmul.f32 %v2397_v50, %v3856_v19 }
 0x25d   : > { %1532 = vrot.lane.b32.xlu1 %v1518_v44, %s2536_s17  ;;  %s2119_s17 = sshll.u32 %s2116_s29, 4  ;;  %s2120_s17 = int_to_ptr.hbm [resolvable:$true] %s2119_s17 }
 0x25e   : > { %v646_v57 = vmul.f32 %v3855_v40, %v630_v7  ;;  %s2443_s24 = sshra.s32 %s2120_s17, 4  ;;  %s2444_s24 = int_to_ptr.hbm [resolvable:$true] %s2443_s24 }
 0x25f   : > { %v1003_v21 = vpop.permute.xlu2 %1002  ;;  %v740_v43 = vpop.permute.xlu1 %739  ;;  %p2450_p3 = scmp.lt.s32.totalorder %s2444_s24, %s3859_s19 }
 0x260   : > { %v1011_v35 = vsel %vm1008_vm0, %v1003_v21, %v3550_v8  ;;  %v745_v1 = vsel %vm741_vm11, %v3494_v58, %v740_v43  ;;  %v757_v4 = vadd.f32 %v740_v43, %v649_v63  ;;  %v3599_v58 = vpop.permute.xlu0 %1137  ;;  %v1823_v21 = vld [vmem:[%s3781_s7 + $0x8] sm:$0xff] }
 0x261   : > { %v1022_v39 = vadd.f32 %v1011_v35, %v888_v17  ;;  %v756_v25 = vadd.f32 %v745_v1, %v648_v48  ;;  %1670 = vrot.lane.b32.xlu0 %v1654_v59, %s2527_s20  ;;  %1668 = vrot.lane.b32.xlu2 %v1653_v6, %s2527_s20  ;;  %v1822_v35 = vld [vmem:[%s3781_s7] sm:$0xff] }
 0x265   : > { %1672 = vrot.lane.b32.xlu1 %v1655_v2, %s2527_s20 }
 0x267   : > { %v997_v20 = vpop.permute.xlu2 %996  ;;  %v734_v54 = vpop.permute.xlu1 %733 }
 0x268   : > { %v1009_v9 = vsel %vm1008_vm0, %v997_v20, %v3577_v3  ;;  %v743_v24 = vsel %vm741_vm11, %v3504_v31, %v734_v54  ;;  %v1650_v31 = vmul.f32 %v3500_v26, %v1636_v28  ;;  %v1132_v47 = vpop.permute.xlu0 %1131  ;;  %v754_v46 = vadd.f32 %v734_v54, %v646_v57 }
 0x269   : > { %v1019_v53 = vadd.f32 %v1009_v9, %v885_v45  ;;  %1758 = vrot.lane.b32.xlu2 %v1750_v15, %s2501_s30  ;;  %1760 = vrot.lane.b32.xlu0 %v1751_v13, %s2501_s30  ;;  %v1652_v45 = vmul.f32 %v3500_v26, %v1638_v27  ;;  %v753_v60 = vadd.f32 %v743_v24, %v645_v42  ;;  %v1774_v26 = vld [vmem:[%s3780_s6] sm:$0xff] }
 0x26d   : > { %1790 = vperm.xlu1 %2354, %v1776_v52  }
 0x26f   : > { %v1136_v30 = vpop.permute.xlu2 %1135  ;;  %v874_v11 = vpop.permute.xlu1 %873 }
 0x270   : > { %v1144_v37 = vsel %vm1141_vm2, %v1136_v30, %v3599_v58  ;;  %v878_v51 = vsel %vm810_vm4, %v3520_v10, %v874_v11  ;;  %v890_v36 = vadd.f32 %v874_v11, %v757_v4  ;;  %v1775_v10 = vld [vmem:[%s3780_s6 + $0x8] sm:$0xff]  ;;  %v1271_v17 = vpop.permute.xlu0 %1270 }
 0x271   : > { %v1155_v22 = vadd.f32 %v1144_v37, %v1022_v39  ;;  %v889_v23 = vadd.f32 %v878_v51, %v756_v25  ;;  %1843 = vperm.xlu2 %2355, %v1825_v33   ;;  %1662 = vrot.lane.b32.xlu0 %v1650_v31, %s2527_s20 }
 0x275   : > { %1664 = vrot.lane.b32.xlu1 %v1651_v5, %s2527_s20 }
 0x277   : > { %v1130_v61 = vpop.permute.xlu2 %1129  ;;  %v868_v44 = vpop.permute.xlu1 %867 }
 0x278   : > { %v1142_v19 = vsel %vm1141_vm2, %v1130_v61, %v1132_v47  ;;  %v876_v29 = vsel %vm810_vm4, %v3534_v55, %v868_v44  ;;  %v887_v62 = vadd.f32 %v868_v44, %v754_v46  ;;  %vm1540_vm4 = vcmask 777216  }
 0x279   : > { %v1152_v18 = vadd.f32 %v1142_v19, %v1019_v53  ;;  %v886_v40 = vadd.f32 %v876_v29, %v753_v60  ;;  %1666 = vrot.lane.b32.xlu2 %v1652_v45, %s2527_s20  ;;  %1785 = vperm.xlu0 %2356, %v1775_v10   ;;  %s2117_s20 = sshll.u32 %s460_s21, 4  ;;  %s2118_s20 = int_to_ptr.vmem [resolvable:$true] %s2117_s20 }
 0x27c   : > { %v1265_v43 = vpop.permute.xlu0 %1264 }
 0x27d   : > { %1838 = vperm.xlu1 %2354, %v1824_v38  }
 0x27f   : > { %v1269_v32 = vpop.permute.xlu2 %1268  ;;  %v1007_v49 = vpop.permute.xlu1 %1006 }
 0x280   : > { %v1277_v55 = vsel %vm1274_vm3, %v1269_v32, %v1271_v17  ;;  %v1012_v63 = vsel %vm1008_vm0, %v3550_v8, %v1007_v49  ;;  %v1024_v6 = vadd.f32 %v1007_v49, %v890_v36 }
 0x281   : > { %v1288_v59 = vadd.f32 %v1277_v55, %v1155_v22  ;;  %v1023_v48 = vadd.f32 %v1012_v63, %v889_v23  ;;  %1780 = vperm.xlu2 %2355, %v1774_v26  }
 0x284   : > { %v3654_v12 = vpop.permute.xlu0 %1404 }
 0x285   : > { %1833 = vperm.xlu1 %2354, %v1823_v21  }
 0x287   : > { %v1263_v1 = vpop.permute.xlu2 %1262  ;;  %v1001_v4 = vpop.permute.xlu1 %1000 }
 0x288   : > { %v1275_v56 = vsel %vm1274_vm3, %v1263_v1, %v1265_v43  ;;  %v1010_v8 = vsel %vm1008_vm0, %v3577_v3, %v1001_v4  ;;  %v1021_v39 = vadd.f32 %v1001_v4, %v887_v62 }
 0x289   : > { %v1285_v25 = vadd.f32 %v1275_v56, %v1152_v18  ;;  %v1020_v2 = vadd.f32 %v1010_v8, %v886_v40  ;;  %1828 = vperm.xlu2 %2355, %v1822_v35  }
 0x28f   : > { %v1403_v0 = vpop.permute.xlu2 %1402  ;;  %v1140_v15 = vpop.permute.xlu1 %1139 }
 0x290   : > { %v1410_v13 = vsel %vm1077_vm1, %v1403_v0, %v3654_v12  ;;  %v1145_v20 = vsel %vm1141_vm2, %v3599_v58, %v1140_v15  ;;  %v1157_v54 = vadd.f32 %v1140_v15, %v1024_v6 }
 0x291   : > { %v1421_v9 = vadd.f32 %v1410_v13, %v1288_v59  ;;  %v1156_v24 = vadd.f32 %v1145_v20, %v1023_v48 }
 0x297   : > { %v1134_v53 = vpop.permute.xlu1 %1133 }
 0x298   : > { %v1143_v3 = vsel %vm1141_vm2, %v1132_v47, %v1134_v53  ;;  %v1154_v52 = vadd.f32 %v1134_v53, %v1021_v39 }
 0x299   : > { %v1153_v16 = vadd.f32 %v1143_v3, %v1020_v2 }
 0x29b   : > { %v1397_v28 = vpop.permute.xlu2 %1396 }
 0x29f   : > { %v1273_v33 = vpop.permute.xlu1 %1272 }
 0x2a0   : > { %v1278_v31 = vsel %vm1274_vm3, %v1271_v17, %v1273_v33  ;;  %v1290_v50 = vadd.f32 %v1273_v33, %v1157_v54 }
 0x2a1   : > { %v1289_v7 = vadd.f32 %v1278_v31, %v1156_v24 }
 0x2a3   : > { %v1535_v30 = vpop.permute.xlu2 %1534 }
 0x2a7   : > { %v1267_v11 = vpop.permute.xlu1 %1266 }
 0x2a8   : > { %v1276_v34 = vsel %vm1274_vm3, %v1265_v43, %v1267_v11  ;;  %v1287_v14 = vadd.f32 %v1267_v11, %v1154_v52 }
 0x2a9   : > { %v1286_v58 = vadd.f32 %v1276_v34, %v1153_v16 }
 0x2ab   : > { %v1763_v37 = vpop.permute.xlu2 %1762 }
 0x2af   : > { %v1407_v51 = vpop.permute.xlu1 %1406 }
 0x2b0   : > { %v1423_v36 = vadd.f32 %v1407_v51, %v1290_v50  ;;  %v1411_v8 = vsel %vm1077_vm1, %v3654_v12, %v1407_v51 }
 0x2b1   : > { %v1422_v3 = vadd.f32 %v1411_v8, %v1289_v7 }
 0x2b3   : > { %v1399_v41 = vpop.permute.xlu0 %1398  ;;  %v1529_v22 = vpop.permute.xlu2 %1528 }
 0x2b4   : > { %v1408_v47 = vsel %vm1077_vm1, %v1397_v28, %v1399_v41 }
 0x2b5   : > { %v1418_v23 = vadd.f32 %v1408_v47, %v1285_v25 }
 0x2b7   : > { %v1401_v5 = vpop.permute.xlu1 %1400 }
 0x2b8   : > { %v1409_v43 = vsel %vm1077_vm1, %v1399_v41, %v1401_v5  ;;  %v1420_v35 = vadd.f32 %v1401_v5, %v1287_v14 }
 0x2b9   : > { %v1419_v4 = vadd.f32 %v1409_v43, %v1286_v58 }
 0x2bb   : > { %v1537_v57 = vpop.permute.xlu0 %1536  ;;  %v1669_v27 = vpop.permute.xlu2 %1668 }
 0x2bc   : > { %v1543_v42 = vsel %vm1540_vm4, %v1535_v30, %v1537_v57 }
 0x2bd   : > { %v3665_v46 = vadd.f32 %v1543_v42, %v1421_v9 }
 0x2bf   : > { %v1539_v10 = vpop.permute.xlu1 %1538 }
 0x2c0   : > { %v1544_v0 = vsel %vm1540_vm4, %v1537_v57, %v1539_v10  ;;  %v1556_v52 = vadd.f32 %v1539_v10, %v1423_v36 }
 0x2c1   : > { %v1555_v31 = vadd.f32 %v1544_v0, %v1422_v3 }
 0x2c3   : > { %v1765_v45 = vpop.permute.xlu0 %1764  ;;  %v1759_v60 = vpop.permute.xlu2 %1758 }
 0x2c4   : > { %v1767_v44 = vsel %vm623_vm15, %v1763_v37, %v1765_v45 }
 0x2c7   : > { %v1796_v61 = vpop.permute.xlu1 %1795 }
 0x2c8   : > { %v1807_v19 = vadd.f32 %v1796_v61, %v1763_v37  ;;  %v1808_v29 = vadd.f32 %v1796_v61, %v1767_v44  ;;  %v1809_v54 = vadd.f32 %v1796_v61, %v1765_v45 }
 0x2ca   : > { %vm1819_vm5 = vcmp.ge.f32.partialorder %v1807_v19, 0.0  ;;  %vm1820_vm6 = vcmp.ge.f32.partialorder %v1808_v29, 0.0  ;;  %vm1821_vm8 = vcmp.ge.f32.partialorder %v1809_v54, 0.0 }
 0x2cb   : > { %v1531_v62 = vpop.permute.xlu0 %1530  ;;  %v1844_v18 = vpop.permute.xlu2 %1843 }
 0x2cc   : > { %v1855_v40 = vmul.f32 %v1844_v18, %v1807_v19  ;;  %v1856_v17 = vmul.f32 %v1844_v18, %v1808_v29  ;;  %v1541_v9 = vsel %vm1540_vm4, %v1529_v22, %v1531_v62  ;;  %v1857_v16 = vmul.f32 %v1844_v18, %v1809_v54 }
 0x2cd   : > { %v1551_v50 = vadd.f32 %v1541_v9, %v1418_v23 }
 0x2ce   : > { %v1867_v38 = vsel %vm1819_vm5, %v1807_v19, %v1855_v40  ;;  %v1868_v26 = vsel %vm1820_vm6, %v1808_v29, %v1856_v17  ;;  %v1869_v51 = vsel %vm1821_vm8, %v1809_v54, %v1857_v16 }
 0x2cf   : > { %v1533_v32 = vpop.permute.xlu1 %1532  ;;  %v2367_v49 = vpack.i.bf16 %v1868_v26, %v1867_v38 }
 0x2d0   : > { %v1542_v1 = vsel %vm1540_vm4, %v1531_v62, %v1533_v32  ;;  %v1553_v56 = vadd.f32 %v1533_v32, %v1420_v35 }
 0x2d1   : > { %2368 = vrot.lane.b32.xlu0 %v2367_v49, %s2534_s22  ;;  %v1552_v39 = vadd.f32 %v1542_v1, %v1419_v4 }
 0x2d3   : > { %v1671_v55 = vpop.permute.xlu0 %1670  ;;  %v1667_v63 = vpop.permute.xlu2 %1666 }
 0x2d4   : > { %v1686_v25 = vadd.f32 %v1667_v63, %v1553_v56  ;;  %v1676_v37 = vsel %vm1209_vm7, %v1669_v27, %v1671_v55 }
 0x2d5   : > { %v1687_v10 = vadd.f32 %v1676_v37, %v3665_v46 }
 0x2d7   : > { %v1673_v6 = vpop.permute.xlu1 %1672 }
 0x2d8   : > { %v1677_v36 = vsel %vm1209_vm7, %v1671_v55, %v1673_v6  ;;  %v1689_v29 = vadd.f32 %v1673_v6, %v1556_v52 }
 0x2d9   : > { %v1688_v19 = vadd.f32 %v1677_v36, %v1555_v31 }
 0x2db   : > { %v1761_v59 = vpop.permute.xlu0 %1760  ;;  %v1781_v48 = vpop.permute.xlu2 %1780 }
 0x2dc   : > { %v1800_v24 = vadd.f32 %v1781_v48, %v1686_v25  ;;  %v1766_v30 = vsel %vm623_vm15, %v1759_v60, %v1761_v59 }
 0x2de   : > { %vm1812_vm11 = vcmp.ge.f32.partialorder %v1800_v24, 0.0 }
 0x2df   : > { %v1791_v21 = vpop.permute.xlu1 %1790 }
 0x2e0   : > { %v1804_v11 = vadd.f32 %v1791_v21, %v1759_v60  ;;  %v1805_v34 = vadd.f32 %v1791_v21, %v1766_v30  ;;  %v1806_v14 = vadd.f32 %v1791_v21, %v1761_v59  ;;  %v1870_v30 = vld [vmem:[%s3782_s8] sm:$0xff] }
 0x2e2   : > { %vm1816_vm12 = vcmp.ge.f32.partialorder %v1804_v11, 0.0  ;;  %vm1817_vm13 = vcmp.ge.f32.partialorder %v1805_v34, 0.0  ;;  %vm1818_vm14 = vcmp.ge.f32.partialorder %v1806_v14, 0.0 }
 0x2e3   : > { %v1663_v15 = vpop.permute.xlu0 %1662  ;;  %v1829_v13 = vpop.permute.xlu2 %1828 }
 0x2e4   : > { %v1848_v28 = vmul.f32 %v1829_v13, %v1800_v24 }
 0x2e6   : > { %v1860_v41 = vsel %vm1812_vm11, %v1800_v24, %v1848_v28 }
 0x2e7   : > { %v1665_v2 = vpop.permute.xlu1 %1664 }
 0x2e8   : > { %v1675_v20 = vsel %vm1209_vm7, %v1665_v2, %v1667_v63  ;;  %v1674_v12 = vsel %vm1209_vm7, %v1663_v15, %v1665_v2 }
 0x2e9   : > { %v1685_v53 = vadd.f32 %v1675_v20, %v1552_v39  ;;  %v1684_v7 = vadd.f32 %v1674_v12, %v1551_v50 }
 0x2eb   : > { %v1799_v33 = vadd.f32 %v1781_v48, %v1685_v53  ;;  %v1798_v45 = vadd.f32 %v1781_v48, %v1684_v7  ;;  %v1786_v60 = vpop.permute.xlu0 %1785 }
 0x2ec   : > { %v1801_v40 = vadd.f32 %v1786_v60, %v1687_v10  ;;  %v1802_v17 = vadd.f32 %v1786_v60, %v1688_v19  ;;  %v1803_v38 = vadd.f32 %v1786_v60, %v1689_v29 }
 0x2ed   : > { %vm1811_vm1 = vcmp.ge.f32.partialorder %v1799_v33, 0.0  ;;  %v1847_v58 = vmul.f32 %v1829_v13, %v1799_v33  ;;  %v1846_v46 = vmul.f32 %v1829_v13, %v1798_v45  ;;  %vm1810_vm7 = vcmp.ge.f32.partialorder %v1798_v45, 0.0 }
 0x2ee   : > { %vm1813_vm15 = vcmp.ge.f32.partialorder %v1801_v40, 0.0  ;;  %vm1814_vm0 = vcmp.ge.f32.partialorder %v1802_v17, 0.0  ;;  %vm1815_vm3 = vcmp.ge.f32.partialorder %v1803_v38, 0.0 }
 0x2ef   : > { %v1839_v22 = vpop.permute.xlu1 %1838  ;;  %v1859_v47 = vsel %vm1811_vm1, %v1799_v33, %v1847_v58  ;;  %v1858_v48 = vsel %vm1810_vm7, %v1798_v45, %v1846_v46 }
 0x2f0   : > { %v1852_v5 = vmul.f32 %v1839_v22, %v1804_v11  ;;  %v1853_v23 = vmul.f32 %v1839_v22, %v1805_v34  ;;  %v1854_v57 = vmul.f32 %v1839_v22, %v1806_v14  ;;  %v2382_v42 = vpack.i.bf16 %v1860_v41, %v1859_v47 }
 0x2f2   : > { %v1864_v27 = vsel %vm1816_vm12, %v1804_v11, %v1852_v5  ;;  %v1865_v61 = vsel %vm1817_vm13, %v1805_v34, %v1853_v23  ;;  %v1866_v44 = vsel %vm1818_vm14, %v1806_v14, %v1854_v57  ;;  %v1871_v14 = vld [vmem:[%s3782_s8 + $0x8] sm:$0xff]  ;;  %v1984_v57 = vld [vmem:[%s3783_s9] sm:$0xf] }
 0x2f3   : > { %v2357_v62 = vpack.i.bf16 %v1866_v44, %v1865_v61  ;;  %v2362_v18 = vpack.i.bf16 %v1864_v27, %v1869_v51  ;;  %v2011_v27 = vld [vmem:[%s3785_s11] sm:$0xff]  ;;  %v2012_v61 = vld [vmem:[%s3785_s11 + $0x8] sm:$0xff] }
 0x2f4   : > { %v2013_v44 = vld [vmem:[%s3786_s12] sm:$0xff] }
 0x2f5   : > { %2358 = vrot.lane.b32.xlu2 %v2357_v62, %s2534_s22  ;;  %2363 = vrot.lane.b32.xlu1 %v2362_v18, %s2534_s22 }
 0x2f7   : > { %v1834_v26 = vpop.permute.xlu1 %1833 }
 0x2f8   : > { %v1849_v32 = vmul.f32 %v1834_v26, %v1801_v40  ;;  %v1850_v49 = vmul.f32 %v1834_v26, %v1802_v17  ;;  %v1851_v55 = vmul.f32 %v1834_v26, %v1803_v38 }
 0x2fa   : > { %v1861_v63 = vsel %vm1813_vm15, %v1801_v40, %v1849_v32  ;;  %v1862_v6 = vsel %vm1814_vm0, %v1802_v17, %v1850_v49  ;;  %v1863_v59 = vsel %vm1815_vm3, %v1803_v38, %v1851_v55  ;;  %v2014_v40 = vld [vmem:[%s3786_s12 + $0x8] sm:$0xff] }
 0x2fb   : > { %v2372_v21 = vpack.i.bf16 %v1862_v6, %v1861_v63  ;;  %v2377_v43 = vpack.i.bf16 %v1858_v48, %v1863_v59 }
 0x2fd   : > { %2373 = vrot.lane.b32.xlu0 %v2372_v21, %s2534_s22  ;;  %2383 = vrot.lane.b32.xlu2 %v2382_v42, %s2534_s22  ;;  %v1985_v42 = vld [vmem:[%s3784_s10] sm:$0xf] }
 0x2fe   : > { %2378 = vrot.lane.b32.xlu1 %v2377_v43, %s2534_s22  ;;  %s2445_s22 = scalar_lea.hbm %s2444_s24, 32 }
 0x2ff   : > { %p2446_p6 = scmp.ne.s32.totalorder %s2444_s24, %s2445_s22  ;;  %p2451_p4 = scmp.lt.s32.totalorder %s2449_s14, %s2445_s22 }
 0x301   : > { %p2447_p13 = pnand %p2446_p6, %p2655_p11  ;;  %p2452_p5 = por %p2451_p4, %p2450_p3 }
 0x303   : > { %p2448_p2 = pneg %p2447_p13 }
 0x305   : > { %p2453_p7 = pnand %p2452_p5, %p2448_p2 }
 0x343   : > { %v2369_v35 = vpop.permute.xlu0 %2368 }
 0x344   : > { %v2371_v1 = vunpack.i.h.bf16 %v2369_v35  ;;  %v2370_v4 = vunpack.i.l.bf16 %v2369_v35 }
 0x346   : > { %v1914_v56 = vsel %vm1141_vm2, %v2370_v4, %v2371_v1 }
 0x347   : > { %1942 = vmatpush.msra.mxu2 %v1914_v56 }
 0x34f   : > { %v2359_v8 = vpop.permute.xlu2 %2358 }
 0x350   : > { %v2361_v25 = vunpack.i.h.bf16 %v2359_v8  ;;  %v2360_v2 = vunpack.i.l.bf16 %v2359_v8 }
 0x352   : > { %v1913_v54 = vsel %vm1141_vm2, %v2360_v2, %v2361_v25 }
 0x357   : > { %v2384_v9 = vpop.permute.xlu2 %2383 }
 0x358   : > { %v2386_v16 = vunpack.i.h.bf16 %v2384_v9  ;;  %v2385_v28 = vunpack.i.l.bf16 %v2384_v9 }
 0x35a   : > { %v1909_v34 = vsel %vm1141_vm2, %v2385_v28, %v2386_v16 }
 0x367   : > { %v2364_v39 = vpop.permute.xlu1 %2363 }
 0x368   : > { %v2366_v0 = vunpack.i.h.bf16 %v2364_v39  ;;  %v2365_v15 = vunpack.i.l.bf16 %v2364_v39 }
 0x36a   : > { %v1912_v13 = vsel %vm1141_vm2, %v2366_v0, %v2360_v2  ;;  %v1915_v20 = vsel %vm1141_vm2, %v2371_v1, %v2365_v15 }
 0x36b   : > { %1943 = vmatpush.msra.mxu2 %v1912_v13  ;;  %1965 = vmatpush.msra.mxu3 %v1915_v20 }
 0x36d   : > { %1966 = vmatpush.msra.mxu3 %v1913_v54 }
 0x36f   : > { %v2374_v24 = vpop.permute.xlu0 %2373 }
 0x370   : > { %v2376_v53 = vunpack.i.h.bf16 %v2374_v24  ;;  %v2375_v3 = vunpack.i.l.bf16 %v2374_v24  ;;  %v2379_v52 = vpop.permute.xlu1 %2378 }
 0x371   : > { %v2381_v12 = vunpack.i.h.bf16 %v2379_v52  ;;  %v2380_v33 = vunpack.i.l.bf16 %v2379_v52 }
 0x372   : > { %v1910_v31 = vsel %vm1141_vm2, %v2375_v3, %v2376_v53 }
 0x373   : > { %1944 = vmatpush.msra.mxu2 %v1910_v31  ;;  %v1911_v50 = vsel %vm1141_vm2, %v2376_v53, %v2380_v33  ;;  %v1908_v11 = vsel %vm1141_vm2, %v2381_v12, %v2385_v28  ;;  %vm2021_vm2 = vcmask 1043456  }
 0x374   : > { %1967 = vmatpush.msra.mxu3 %v1911_v50 }
 0x375   : > { %1945 = vmatpush.msra.mxu2 %v1908_v11 }
 0x376   : > { %1968 = vmatpush.msra.mxu3 %v1909_v34  ;;  %2220 = vmatmul.msk.f32.vlgmr.msra.gmra.mxu2 %vm1034_vm10, %v1870_v30 }
 0x377   : > { %2222 = vmatmul.msk.f32.vlgmr.msra.gmra.mxu3 %vm1034_vm10, %v1870_v30 }
 0x37e   : > { %2221 = vmatmul.msk.f32.gmra.mxu2 %vm1034_vm10, %v1871_v14 }
 0x37f   : > { %2223 = vmatmul.msk.f32.gmra.mxu3 %vm1034_vm10, %v1871_v14  ;;  %vm1986_vm10 = vcmask 130048  }
 0x3f9   : > { %v3704_v58 = vpop.f32.mrf.mxu2 }
 0x3fa   : > { %v3706_v37 = vpop.f32.mrf.mxu3 }
 0x3fb   : > { %v1976_v7 = vadd.f32 %v3706_v37, %v3704_v58 }
 0x3fd   : > { %1977 = vadd.xlane.f32.xlu1 %v1976_v7 }
 0x401   : > { %v3710_v51 = vpop.f32.mrf.mxu2 }
 0x402   : > { %v3712_v36 = vpop.f32.mrf.mxu3 }
 0x403   : > { %v1979_v41 = vadd.f32 %v3712_v36, %v3710_v51 }
 0x405   : > { %1980 = vadd.xlane.f32.xlu0 %v1979_v41 }
 0x470   : > { %v1978_v22 = vpop.xlane.xlu1 %1977 }
 0x471   : > { %v1982_v23 = vmul.f32 0.00390625, %v1978_v22 }
 0x478   : > { %v1981_v47 = vpop.xlane.xlu0 %1980 }
 0x479   : > { %v1983_v5 = vmul.f32 0.00390625, %v1981_v47 }
 0x47b   : > { %2004 = vmatpush.msrb.mxu2 %v1983_v5 }
 0x47d   : > { %2005 = vmatpush.msrb.mxu2 %v1982_v23 }
 0x47e   : > { %2224 = vmatmul.msk.f32.vlgmr.msrb.gmra.mxu2 %vm1986_vm10, %v1984_v57 }
 0x501   : > { %v2007_v10 = vpop.f32.mrf.mxu2 }
 0x502   : > { %v2008_v45 = vadd.f32 %v2007_v10, %v1985_v42 }
 0x504   : > { %v2010_v60 = vmax.f32 %v2008_v45, 0.0 }
 0x506   : > { %2225 = vmatpush.msk.msrb.mxu3 %vm2021_vm2, %v2010_v60 }
 0x507   : > { %2226 = vmatmul.msk.f32.vlgmr.msrb.gmra.mxu3 %vm900_vm9, %v2011_v27 }
 0x50f   : > { %2227 = vmatmul.msk.f32.gmra.mxu3 %vm900_vm9, %v2012_v61 }
 0x58a   : > { %v2042_v19 = vpop.f32.mrf.mxu3 }
 0x58b   : > { %v2043_v29 = vadd.f32 %v2042_v19, %v2013_v44 }
 0x58d   : > { %v2048_v62 = vsub.f32 0.0, %v2043_v29 }
 0x58f   : > { %v2050_v18 = vmul.f32 1.442695, %v2048_v62 }
 0x591   : > { %2387 = vpow2.f32 %v2050_v18 }
 0x592   : > { %v2045_v17 = vpop.f32.mrf.mxu3 }
 0x593   : > { %v2046_v38 = vadd.f32 %v2045_v17, %v2014_v40 }
 0x595   : > { %v2049_v46 = vsub.f32 0.0, %v2046_v38 }
 0x597   : > { %v2388_v26 = vpop.eup %2387  ;;  %v2052_v32 = vmul.f32 1.442695, %v2049_v46 }
 0x598   : > { %v2054_v49 = vadd.f32 1.0, %v2388_v26 }
 0x599   : > { %2389 = vpow2.f32 %v2052_v32 }
 0x59a   : > { %2391 = vrcp.f32 %v2054_v49  ;;  %v2067_v21 = vand.u32 2147483648, %v2054_v49  ;;  %v2065_v35 = vand.u32 2147483647, %v2054_v49  ;;  %vm2061_vm4 = vweird.f32 %v2054_v49 }
 0x59c   : > { %v2068_v56 = vor.u32 1.1754944e-38, %v2067_v21  ;;  %vm2066_vm6 = vcmp.eq.f32.partialorder %v2065_v35, 8.507059e+37 }
 0x59f   : > { %v2390_v55 = vpop.eup %2389 }
 0x5a0   : > { %v2392_v63 = vpop.eup %2391  ;;  %v2055_v6 = vadd.f32 1.0, %v2390_v55 }
 0x5a1   : > { %v2057_v59 = vmul.f32 %v2392_v63, %v2054_v49  ;;  %vm2062_vm9 = vweird.f32 %v2392_v63 }
 0x5a2   : > { %2393 = vrcp.f32 %v2055_v6  ;;  %vm2063_vm5 = vmor %vm2061_vm4, %vm2062_vm9  ;;  %v2082_v0 = vand.u32 2147483648, %v2055_v6  ;;  %v2080_v13 = vand.u32 2147483647, %v2055_v6  ;;  %vm2076_vm8 = vweird.f32 %v2055_v6 }
 0x5a3   : > { %v2058_v48 = vsub.f32 1.0, %v2057_v59 }
 0x5a4   : > { %v2083_v54 = vor.u32 1.1754944e-38, %v2082_v0  ;;  %vm2081_vm12 = vcmp.eq.f32.partialorder %v2080_v13, 8.507059e+37 }
 0x5a5   : > { %v2059_v43 = vmul.f32 %v2392_v63, %v2058_v48 }
 0x5a7   : > { %v2060_v1 = vadd.f32 %v2392_v63, %v2059_v43 }
 0x5a8   : > { %v2394_v4 = vpop.eup %2393 }
 0x5a9   : > { %v2064_v8 = vsel %vm2063_vm5, %v2392_v63, %v2060_v1  ;;  %v2072_v39 = vmul.f32 %v2394_v4, %v2055_v6  ;;  %vm2077_vm1 = vweird.f32 %v2394_v4 }
 0x5aa   : > { %v2069_v25 = vsel %vm2066_vm6, %v2068_v56, %v2064_v8  ;;  %vm2078_vm11 = vmor %vm2076_vm8, %vm2077_vm1 }
 0x5ab   : > { %2088 = vperm.xlu2 %2355, %v2069_v25   ;;  %v2073_v2 = vsub.f32 1.0, %v2072_v39 }
 0x5ad   : > { %v2074_v15 = vmul.f32 %v2394_v4, %v2073_v2 }
 0x5af   : > { %v2075_v20 = vadd.f32 %v2394_v4, %v2074_v15 }
 0x5b1   : > { %v2079_v9 = vsel %vm2078_vm11, %v2394_v4, %v2075_v20 }
 0x5b2   : > { %v2084_v24 = vsel %vm2081_vm12, %v2083_v54, %v2079_v9 }
 0x5b3   : > { %2093 = vperm.xlu2 %2355, %v2084_v24  }
 0x605   : > { %v2089_v53 = vpop.permute.xlu2 %2088 }
 0x606   : > { %v2096_v3 = vmul.f32 %v2089_v53, %v3704_v58  ;;  %v2097_v52 = vmul.f32 %v2089_v53, %v3706_v37 }
 0x608   : > { %2100 = vst [vmem:[%s460_s21] sm:$0xff] %v2096_v3 }
 0x609   : > { %2101 = vst [vmem:[%s460_s21 + $0x8] sm:$0xff] %v2097_v52 }
 0x60d   : > { %v2094_v16 = vpop.permute.xlu2 %2093 }
 0x60e   : > { %v2098_v28 = vmul.f32 %v2094_v16, %v3710_v51  ;;  %v2099_v12 = vmul.f32 %v2094_v16, %v3712_v36 }
 0x610   : > { %2102 = vst [vmem:[%s460_s21 + $0x10] sm:$0xff] %v2098_v28 }
 0x611   : > { %2103 = vst [vmem:[%s460_s21 + $0x18] sm:$0xff] %v2099_v12 }
 0x612   : > { %2456 = shalt.err (!%p2453_p7)
}
 0x613   : > { %s2537_s23 = smov 256   ;;  %s2538_s21 = smov 16  }
 0x614   : > { %2239 = dma.vmem_to_hbm [thread:$0]  (%p2655_p11), %s2118_s20, 512, %s2120_s17, %s2105_s27, %s2537_s23, %s2537_s23, %s2538_s21  }
 0x615 PF: > { %s3861_s25 = sld [smem:[#allocation9_spill]]  ;;  %p2246_p8 = pnand %p2195_p9, %p2659_p12 }
 0x617   : > { %p2247_p10 = pneg %p2246_p8 }
 0x61b   : > { %s2134_s0 = sand.u32 1, %s3861_s25  }
 0x61c   : > { %s2135_s15 = scalar_lea.sflag [#allocation5], %s2134_s0 }
 0x61d   : > { %2478 = dma.done.wait (%p2247_p10), %s2135_s15, 512  }
 0x61e   : > { %2480 = vsyncadd (%p2247_p10), %s2135_s15, 4294966784  ;;  %s3863_s28 = sld [smem:[#allocation12_spill]]  ;;  %s3866_s25 = smov %s2487_s26 }
 0x61f   : > { %s3864_s24 = sld [smem:[#allocation10_spill]] }
 0x620   : > { %s3865_s27 = sld [smem:[#allocation13_spill]] }
 0x624   : > { %p26_p0 = scmp.ge.s32.totalorder %s3863_s28, 4  }
 0x625   : > { %s3867_s26 = smov %s3864_s24 }
 0x626   :  { %28 = sbr.rel (!%p26_p0) target bundleno = 8 (0x8), region = 134 }
 0x62b   :  { %2141 = vsyncpa [#allocation4], 1 }
 0x62c   :  { %2143 = vsyncpa [#allocation4 + $0x1], 1 }
 0x62d   :  { %2144 = vsyncpa [#allocation5], 1 }
 0x62e   :  { %2146 = vsyncpa [#allocation5 + $0x1], 1 }

</bundles_post_ra>
